<compile_context>
chip_gen: v6e
topology: v6e:2x2x1
jax: 0.10.0
libtpu: 0.0.40
codegen_flags: <defaults>
</compile_context>

<pallas_src>
import functools

import numpy as np
import jax
import jax.numpy as jnp
from jax import lax
from jax.experimental import pallas as pl
from jax.experimental.pallas import tpu as pltpu


IN_DIM = 64
MEM_DIM = 128


def _round_up(x, m):
    return (x + m - 1) // m * m


# ---------------------------------------------------------------------------
# Pallas kernel: ONE invocation for the whole tree; in-kernel loop over levels.
# ---------------------------------------------------------------------------
def _make_tree_lstm_kernel(num_levels, w_pad, maxc, mem):
    def kernel(child_tbl_ref,                               # SMEM scalar prefetch
               xs_ref, wx_ref, bx_ref, whi_ref, whf_ref,    # VMEM inputs (resident)
               c_all_ref, h_all_ref,                        # VMEM outputs == resident state
               xw_scr, ch_buf, cc_buf):                     # VMEM scratch
        # Zero the state buffers once: rows >= num_levels*w_pad are the
        # dedicated always-zero rows that padded child slots point at.
        c_all_ref[...] = jnp.zeros_like(c_all_ref)
        h_all_ref[...] = jnp.zeros_like(h_all_ref)

        # Hoisted x-side linear: ONE well-shaped matmul for every node slot
        # (input rows already host-gathered into schedule order), resident in
        # VMEM.  bx already contains b_ioux+b_iouh | b_fx+b_fh.
        xw_scr[...] = (jnp.dot(xs_ref[...], wx_ref[...],
                               preferred_element_type=jnp.float32) + bx_ref[...])

        def level_body(l, carry):
            lvl_base = pl.multiple_of(l * w_pad, w_pad)

            # ---- gather the (padded) child states of this level's nodes into
            #      scratch; child j of node-slot w lands at row j*w_pad + w
            #      (static destination rows, dynamic source rows). -------------
            for w in range(w_pad):
                tbl_base = (l * w_pad + w) * maxc
                for j in range(maxc):
                    cidx = child_tbl_ref[tbl_base + j]
                    dst = j * w_pad + w
                    ch_buf[pl.ds(dst, 1), :] = h_all_ref[pl.ds(cidx, 1), :]
                    cc_buf[pl.ds(dst, 1), :] = c_all_ref[pl.ds(cidx, 1), :]

            child_h = ch_buf[...]                            # (w_pad*maxc, mem)
            child_c = cc_buf[...]

            # per-node sum over children: maxc aligned VPU block adds
            child_h_sum = child_h[0:w_pad, :]
            for j in range(1, maxc):
                child_h_sum = child_h_sum + child_h[j * w_pad:(j + 1) * w_pad, :]

            xw_lvl = xw_scr[pl.ds(lvl_base, w_pad), :]       # (w_pad, 4*mem)

            # iou = (ioux(x)+b_ioux) + (iouh(child_h_sum)+b_iouh)
            iou = xw_lvl[:, :3 * mem] + jnp.dot(
                child_h_sum, whi_ref[...], preferred_element_type=jnp.float32)
            i = jax.nn.sigmoid(iou[:, 0 * mem:1 * mem])
            o = jax.nn.sigmoid(iou[:, 1 * mem:2 * mem])
            u = jnp.tanh(iou[:, 2 * mem:3 * mem])

            # f = sigmoid(fh(child_h) + fx(x) + b_fx + b_fh); padded child rows
            # have child_c == 0, so their contribution to sum(f*c) is exactly 0.
            fx = xw_lvl[:, 3 * mem:]                         # (w_pad, mem)
            f_pre = jnp.dot(child_h, whf_ref[...],
                            preferred_element_type=jnp.float32)   # (w_pad*maxc, mem)
            fc_sum = jax.nn.sigmoid(f_pre[0:w_pad, :] + fx) * child_c[0:w_pad, :]
            for j in range(1, maxc):
                blk = slice(j * w_pad, (j + 1) * w_pad)
                fc_sum = fc_sum + jax.nn.sigmoid(f_pre[blk, :] + fx) * child_c[blk, :]

            c = i * u + fc_sum
            h = o * jnp.tanh(c)

            # one aligned (w_pad, mem) store per state buffer for the whole level
            c_all_ref[pl.ds(lvl_base, w_pad), :] = c
            h_all_ref[pl.ds(lvl_base, w_pad), :] = h
            return carry

        lax.fori_loop(0, num_levels, level_body, 0)

    return kernel


@functools.partial(jax.jit,
                   static_argnames=("num_levels", "w_pad", "maxc", "n_pad"))
def _tree_lstm_call(child_tbl, x_idx, inputs, wx, bx, whi, whf,
                    *, num_levels, w_pad, maxc, n_pad):
    mem = MEM_DIM
    in_dim = inputs.shape[1]
    n_slots = num_levels * w_pad

    # Pre-gather input rows into schedule order (padded slots -> appended zero
    # row) so the x-side linear is a single well-shaped matmul in the kernel.
    inputs_ext = jnp.concatenate(
        [inputs.astype(jnp.float32), jnp.zeros((1, in_dim), jnp.float32)], axis=0)
    xs = inputs_ext[x_idx]                                   # (n_slots, in_dim)

    flops = (2 * n_slots * in_dim * 4 * mem
             + 2 * n_slots * mem * 3 * mem
             + 2 * n_slots * maxc * mem * mem)
    transcendentals = n_slots * (5 * mem + maxc * mem)
    bytes_accessed = 4 * (xs.size + wx.size + bx.size + whi.size + whf.size
                          + 2 * n_pad * mem)

    kernel = _make_tree_lstm_kernel(num_levels, w_pad, maxc, mem)

    grid_spec = pltpu.PrefetchScalarGridSpec(
        num_scalar_prefetch=1,
        grid=(1,),
        in_specs=[
            # Full-array blocks, constant index_maps -> DMA'd once, resident.
            pl.BlockSpec(xs.shape, lambda i, *_: (0, 0)),
            pl.BlockSpec(wx.shape, lambda i, *_: (0, 0)),
            pl.BlockSpec(bx.shape, lambda i, *_: (0, 0)),
            pl.BlockSpec(whi.shape, lambda i, *_: (0, 0)),
            pl.BlockSpec(whf.shape, lambda i, *_: (0, 0)),
        ],
        out_specs=(
            # Single-step grid: outputs are the resident VMEM state buffers and
            # are written back to HBM exactly once.
            pl.BlockSpec((n_pad, mem), lambda i, *_: (0, 0)),
            pl.BlockSpec((n_pad, mem), lambda i, *_: (0, 0)),
        ),
        scratch_shapes=[
            pltpu.VMEM((n_slots, 4 * mem), jnp.float32),     # hoisted XW
            pltpu.VMEM((w_pad * maxc, mem), jnp.float32),    # child_h gather
            pltpu.VMEM((w_pad * maxc, mem), jnp.float32),    # child_c gather
        ],
    )
    return pl.pallas_call(
        kernel,
        grid_spec=grid_spec,
        out_shape=(jax.ShapeDtypeStruct((n_pad, mem), jnp.float32),
                   jax.ShapeDtypeStruct((n_pad, mem), jnp.float32)),
        compiler_params=pltpu.CompilerParams(
            dimension_semantics=("arbitrary",)),   # single, serially-dependent step
        cost_estimate=pl.CostEstimate(flops=flops,
                                      transcendentals=transcendentals,
                                      bytes_accessed=bytes_accessed),
    )(child_tbl, xs, wx, bx, whi, whf)


# ---------------------------------------------------------------------------
# Host-side tree + level schedule construction (recursion stays on the host,
# producing only int32 index tables -- no per-node device work).
# ---------------------------------------------------------------------------
class Tree:
    def __init__(self, idx, children=()):
        self.idx = idx
        self.children = list(children)
        self.num_children = len(self.children)
        self.state = None


def _levelize(tree):
    """Group nodes by depth: leaves at level 0, parent = 1 + max(child levels)."""
    def depth(node):
        node._level = 0 if not node.children else 1 + max(depth(c) for c in node.children)
        return node._level
    depth(tree)
    levels = [[] for _ in range(tree._level + 1)]

    def collect(node):
        for c in node.children:
            collect(c)
        levels[node._level].append(node)
    collect(tree)
    return levels


def _postorder(tree):
    order = []

    def visit(node):
        for c in node.children:
            visit(c)
        order.append(node)
    visit(tree)
    return order


def fuse_params(params):
    """wx=[w_ioux|w_fx], bx=[b_ioux+b_iouh | b_fx+b_fh] (bh folded), w_iouh, w_fh."""
    w_ioux, b_ioux, w_iouh, b_iouh, w_fx, b_fx, w_fh, b_fh = params
    wx = jnp.concatenate([w_ioux, w_fx], axis=1)                   # (IN, 4*MEM)
    bx = jnp.concatenate([b_ioux + b_iouh, b_fx + b_fh], axis=1)   # (1, 4*MEM)
    return wx, bx, w_iouh, w_fh


def tree_lstm_forward_pallas(tree, inputs, params):
    """Whole-tree ChildSum-TreeLSTM forward in a single pallas_call."""
    levels = _levelize(tree)
    num_levels = len(levels)
    maxc = max(1, max(n.num_children for lvl in levels for n in lvl))
    w_pad = _round_up(max(len(lvl) for lvl in levels), 8)
    zero_row = num_levels * w_pad            # always-zero state row (child padding)
    n_pad = zero_row + 8

    seq_len = inputs.shape[0]
    zero_x = seq_len                         # index of the appended zero input row

    x_idx = np.full((num_levels * w_pad,), zero_x, dtype=np.int32)
    child_tbl = np.full((num_levels * w_pad * maxc,), zero_row, dtype=np.int32)
    for l, lvl in enumerate(levels):
        for w, node in enumerate(lvl):
            node._row = l * w_pad + w
            x_idx[node._row] = node.idx
            base = node._row * maxc
            for j, ch in enumerate(node.children):
                child_tbl[base + j] = ch._row        # children live at lower levels

    wx, bx, whi, whf = fuse_params(params)
    c_all, h_all = _tree_lstm_call(
        jnp.asarray(child_tbl), jnp.asarray(x_idx), inputs, wx, bx, whi, whf,
        num_levels=num_levels, w_pad=w_pad, maxc=maxc, n_pad=n_pad)

    # Attach per-node states, mirroring the PyTorch module's `tree.state`.
    for lvl in levels:
        for node in lvl:
            r = node._row
            node.state = (c_all[r:r + 1], h_all[r:r + 1])
    return tree, (c_all, h_all)


# ---------------------------------------------------------------------------
# Pure-JAX reference (mirrors PyTorch node_forward / forward) for correctness.
# ---------------------------------------------------------------------------
def node_forward_ref(x_row, child_c, child_h, params):
    w_ioux, b_ioux, w_iouh, b_iouh, w_fx, b_fx, w_fh, b_fh = params
    child_h_sum = jnp.sum(child_h, axis=0, keepdims=True)
    iou = (x_row @ w_ioux + b_ioux) + (child_h_sum @ w_iouh + b_iouh)
    i, o, u = jnp.split(iou, 3, axis=1)
    i, o, u = jax.nn.sigmoid(i), jax.nn.sigmoid(o), jnp.tanh(u)
    f = jax.nn.sigmoid((child_h @ w_fh + b_fh) + (x_row @ w_fx + b_fx))
    fc = f * child_c
    c = i * u + jnp.sum(fc, axis=0, keepdims=True)
    h = o * jnp.tanh(c)
    return c, h


def tree_lstm_forward_ref(tree, inputs, params):
    for child in tree.children:
        tree_lstm_forward_ref(child, inputs, params)
    if tree.num_children == 0:
        child_c = jnp.zeros((1, MEM_DIM), jnp.float32)
        child_h = jnp.zeros((1, MEM_DIM), jnp.float32)
    else:
        child_c = jnp.concatenate([c.state[0] for c in tree.children], axis=0)
        child_h = jnp.concatenate([c.state[1] for c in tree.children], axis=0)
    x_row = inputs[tree.idx].reshape(1, IN_DIM)
    tree.state = node_forward_ref(x_row, child_c, child_h, params)
    return tree


# ---------------------------------------------------------------------------
# Deterministic parameter init (shapes from nn.Linear in __init__).
# ---------------------------------------------------------------------------
def init_params(key):
    ks = jax.random.split(key, 8)

    def lin(kw, kb, fan_in, fan_out):
        bound = 1.0 / jnp.sqrt(fan_in)
        w = jax.random.uniform(kw, (fan_in, fan_out), jnp.float32, -bound, bound)
        b = jax.random.uniform(kb, (1, fan_out), jnp.float32, -bound, bound)
        return w, b

    w_ioux, b_ioux = lin(ks[0], ks[1], IN_DIM, 3 * MEM_DIM)
    w_iouh, b_iouh = lin(ks[2], ks[3], MEM_DIM, 3 * MEM_DIM)
    w_fx, b_fx = lin(ks[4], ks[5], IN_DIM, MEM_DIM)
    w_fh, b_fh = lin(ks[6], ks[7], MEM_DIM, MEM_DIM)
    return (w_ioux, b_ioux, w_iouh, b_iouh, w_fx, b_fx, w_fh, b_fh)


if __name__ == "__main__":
    key = jax.random.PRNGKey(0)
    kp, kx = jax.random.split(key)
    params = init_params(kp)

    seq_len = 8
    inputs = jax.random.normal(kx, (seq_len, IN_DIM), jnp.float32)

    # small tree:  root(4) -> [ node(2) -> [leaf(0), leaf(1)],  leaf(3) ]
    def build_tree():
        return Tree(4, [Tree(2, [Tree(0), Tree(1)]), Tree(3)])

    # Pallas forward: one kernel launch for the whole tree.
    tree_p = build_tree()
    tree_p, (c_all, h_all) = tree_lstm_forward_pallas(tree_p, inputs, params)
    jax.block_until_ready((c_all, h_all))

    # Reference forward (recursive, true child counts).
    tree_r = build_tree()
    tree_lstm_forward_ref(tree_r, inputs, params)

    # Compare every node's state (postorder alignment).
    for node_p, node_r in zip(_postorder(tree_p), _postorder(tree_r)):
        c_p, h_p = node_p.state
        c_r, h_r = node_r.state
        assert jnp.allclose(c_p, c_r, atol=1e-5, rtol=1e-5), "c mismatch"
        assert jnp.allclose(h_p, h_r, atol=1e-5, rtol=1e-5), "h mismatch"

    root_c, root_h = tree_p.state
    assert root_c.shape == (1, MEM_DIM) and root_h.shape == (1, MEM_DIM)
    print("KERNEL_OK")
</pallas_src>

<mosaic_0001>
module attributes {stable_mosaic.version = 11 : i64} {
  func.func @kernel(%arg0: i32, %arg1: memref<48xi32, #tpu.memory_space<smem>>, %arg2: memref<24x64xf32, #tpu.memory_space<vmem>>, %arg3: memref<64x512xf32, #tpu.memory_space<vmem>>, %arg4: memref<1x512xf32, #tpu.memory_space<vmem>>, %arg5: memref<128x384xf32, #tpu.memory_space<vmem>>, %arg6: memref<128x128xf32, #tpu.memory_space<vmem>>, %arg7: memref<32x128xf32, #tpu.memory_space<vmem>>, %arg8: memref<32x128xf32, #tpu.memory_space<vmem>>, %arg9: memref<24x512xf32, #tpu.memory_space<vmem>>, %arg10: memref<16x128xf32, #tpu.memory_space<vmem>>, %arg11: memref<16x128xf32, #tpu.memory_space<vmem>>) attributes {dimension_semantics = [#tpu.dimension_semantics<arbitrary>], iteration_bounds = array<i64: 1>, scalar_prefetch = 1 : i64, scratch_operands = 3 : i64, tpu.core_type = #tpu.core_type<tc>, window_params = [{pipeline_mode = #tpu.pipeline_mode<synchronous>, transform_indices = @transform_0, window_bounds = array<i64: 24, 64>}, {pipeline_mode = #tpu.pipeline_mode<synchronous>, transform_indices = @transform_1, window_bounds = array<i64: 64, 512>}, {pipeline_mode = #tpu.pipeline_mode<synchronous>, transform_indices = @transform_2, window_bounds = array<i64: 1, 512>}, {pipeline_mode = #tpu.pipeline_mode<synchronous>, transform_indices = @transform_3, window_bounds = array<i64: 128, 384>}, {pipeline_mode = #tpu.pipeline_mode<synchronous>, transform_indices = @transform_4, window_bounds = array<i64: 128, 128>}, {pipeline_mode = #tpu.pipeline_mode<synchronous>, transform_indices = @transform_5, window_bounds = array<i64: 32, 128>}, {pipeline_mode = #tpu.pipeline_mode<synchronous>, transform_indices = @transform_6, window_bounds = array<i64: 32, 128>}]} {
    %cst = arith.constant 0.000000e+00 : f32
    %0 = vector.broadcast %cst : f32 to vector<32x128xf32>
    %c0 = arith.constant 0 : index
    %c0_0 = arith.constant 0 : index
    %1 = vector.load %arg7[%c0, %c0_0] : memref<32x128xf32, #tpu.memory_space<vmem>>, vector<32x128xf32>
    tpu.vector_store %arg7[%c0, %c0_0], %0 {strides = array<i32>} : memref<32x128xf32, #tpu.memory_space<vmem>>, vector<32x128xf32>,
    %cst_1 = arith.constant 0.000000e+00 : f32
    %2 = vector.broadcast %cst_1 : f32 to vector<32x128xf32>
    %c0_2 = arith.constant 0 : index
    %c0_3 = arith.constant 0 : index
    %3 = vector.load %arg8[%c0_2, %c0_3] : memref<32x128xf32, #tpu.memory_space<vmem>>, vector<32x128xf32>
    tpu.vector_store %arg8[%c0_2, %c0_3], %2 {strides = array<i32>} : memref<32x128xf32, #tpu.memory_space<vmem>>, vector<32x128xf32>,
    %c0_4 = arith.constant 0 : index
    %c0_5 = arith.constant 0 : index
    %4 = vector.load %arg2[%c0_4, %c0_5] : memref<24x64xf32, #tpu.memory_space<vmem>>, vector<24x64xf32>
    %c0_6 = arith.constant 0 : index
    %c0_7 = arith.constant 0 : index
    %5 = vector.load %arg3[%c0_6, %c0_7] : memref<64x512xf32, #tpu.memory_space<vmem>>, vector<64x512xf32>
    %cst_8 = arith.constant dense<0.000000e+00> : vector<24x512xf32>
    %6 = tpu.matmul %4, %5, %cst_8 {dimension_numbers = #tpu.dot_dimension_numbers<[1], [0], [0], [1], [0, 0, 1, 1], [], []>} : vector<24x64xf32>, vector<64x512xf32>, vector<24x512xf32> -> vector<24x512xf32>
    %c0_9 = arith.constant 0 : index
    %c0_10 = arith.constant 0 : index
    %7 = vector.load %arg4[%c0_9, %c0_10] : memref<1x512xf32, #tpu.memory_space<vmem>>, vector<1x512xf32>
    %8 = vector.broadcast %7 : vector<1x512xf32> to vector<24x512xf32>
    %9 = arith.addf %6, %8 : vector<24x512xf32>
    %c0_11 = arith.constant 0 : index
    %c0_12 = arith.constant 0 : index
    %10 = vector.load %arg9[%c0_11, %c0_12] : memref<24x512xf32, #tpu.memory_space<vmem>>, vector<24x512xf32>
    tpu.vector_store %arg9[%c0_11, %c0_12], %9 {strides = array<i32>} : memref<24x512xf32, #tpu.memory_space<vmem>>, vector<24x512xf32>,
    %c0_i32 = arith.constant 0 : i32
    %c3_i32 = arith.constant 3 : i32
    %11 = arith.addi %c0_i32, %c3_i32 : i32
    %c1_i32 = arith.constant 1 : i32
    scf.for %arg12 = %c0_i32 to %11 step %c1_i32  : i32 {
      %c8_i32 = arith.constant 8 : i32
      %12 = arith.muli %arg12, %c8_i32 : i32
      %13 = tpu.assume_multiple %12, 8 : i32
      %c8_i32_14 = arith.constant 8 : i32
      %14 = arith.muli %arg12, %c8_i32_14 : i32
      %c0_i32_15 = arith.constant 0 : i32
      %15 = arith.addi %14, %c0_i32_15 : i32
      %c2_i32 = arith.constant 2 : i32
      %16 = arith.muli %15, %c2_i32 : i32
      %c0_i32_16 = arith.constant 0 : i32
      %17 = arith.addi %16, %c0_i32_16 : i32
      %18 = arith.index_cast %17 : i32 to index
      %19 = memref.load %arg1[%18] : memref<48xi32, #tpu.memory_space<smem>>
      %20 = arith.index_cast %19 : i32 to index
      %c0_17 = arith.constant 0 : index
      %21 = vector.load %arg8[%20, %c0_17] : memref<32x128xf32, #tpu.memory_space<vmem>>, vector<1x128xf32>
      %c0_18 = arith.constant 0 : index
      %c0_19 = arith.constant 0 : index
      %22 = vector.load %arg10[%c0_18, %c0_19] : memref<16x128xf32, #tpu.memory_space<vmem>>, vector<1x128xf32>
      tpu.vector_store %arg10[%c0_18, %c0_19], %21 {strides = array<i32>} : memref<16x128xf32, #tpu.memory_space<vmem>>, vector<1x128xf32>,
      %23 = arith.index_cast %19 : i32 to index
      %c0_20 = arith.constant 0 : index
      %24 = vector.load %arg7[%23, %c0_20] : memref<32x128xf32, #tpu.memory_space<vmem>>, vector<1x128xf32>
      %c0_21 = arith.constant 0 : index
      %c0_22 = arith.constant 0 : index
      %25 = vector.load %arg11[%c0_21, %c0_22] : memref<16x128xf32, #tpu.memory_space<vmem>>, vector<1x128xf32>
      tpu.vector_store %arg11[%c0_21, %c0_22], %24 {strides = array<i32>} : memref<16x128xf32, #tpu.memory_space<vmem>>, vector<1x128xf32>,
      %c1_i32_23 = arith.constant 1 : i32
      %26 = arith.addi %16, %c1_i32_23 : i32
      %27 = arith.index_cast %26 : i32 to index
      %28 = memref.load %arg1[%27] : memref<48xi32, #tpu.memory_space<smem>>
      %29 = arith.index_cast %28 : i32 to index
      %c0_24 = arith.constant 0 : index
      %30 = vector.load %arg8[%29, %c0_24] : memref<32x128xf32, #tpu.memory_space<vmem>>, vector<1x128xf32>
      %c8 = arith.constant 8 : index
      %c0_25 = arith.constant 0 : index
      %31 = vector.load %arg10[%c8, %c0_25] : memref<16x128xf32, #tpu.memory_space<vmem>>, vector<1x128xf32>
      tpu.vector_store %arg10[%c8, %c0_25], %30 {strides = array<i32>} : memref<16x128xf32, #tpu.memory_space<vmem>>, vector<1x128xf32>,
      %32 = arith.index_cast %28 : i32 to index
      %c0_26 = arith.constant 0 : index
      %33 = vector.load %arg7[%32, %c0_26] : memref<32x128xf32, #tpu.memory_space<vmem>>, vector<1x128xf32>
      %c8_27 = arith.constant 8 : index
      %c0_28 = arith.constant 0 : index
      %34 = vector.load %arg11[%c8_27, %c0_28] : memref<16x128xf32, #tpu.memory_space<vmem>>, vector<1x128xf32>
      tpu.vector_store %arg11[%c8_27, %c0_28], %33 {strides = array<i32>} : memref<16x128xf32, #tpu.memory_space<vmem>>, vector<1x128xf32>,
      %c8_i32_29 = arith.constant 8 : i32
      %35 = arith.muli %arg12, %c8_i32_29 : i32
      %c1_i32_30 = arith.constant 1 : i32
      %36 = arith.addi %35, %c1_i32_30 : i32
      %c2_i32_31 = arith.constant 2 : i32
      %37 = arith.muli %36, %c2_i32_31 : i32
      %c0_i32_32 = arith.constant 0 : i32
      %38 = arith.addi %37, %c0_i32_32 : i32
      %39 = arith.index_cast %38 : i32 to index
      %40 = memref.load %arg1[%39] : memref<48xi32, #tpu.memory_space<smem>>
      %41 = arith.index_cast %40 : i32 to index
      %c0_33 = arith.constant 0 : index
      %42 = vector.load %arg8[%41, %c0_33] : memref<32x128xf32, #tpu.memory_space<vmem>>, vector<1x128xf32>
      %c1 = arith.constant 1 : index
      %c0_34 = arith.constant 0 : index
      %43 = vector.load %arg10[%c1, %c0_34] : memref<16x128xf32, #tpu.memory_space<vmem>>, vector<1x128xf32>
      tpu.vector_store %arg10[%c1, %c0_34], %42 {strides = array<i32>} : memref<16x128xf32, #tpu.memory_space<vmem>>, vector<1x128xf32>,
      %44 = arith.index_cast %40 : i32 to index
      %c0_35 = arith.constant 0 : index
      %45 = vector.load %arg7[%44, %c0_35] : memref<32x128xf32, #tpu.memory_space<vmem>>, vector<1x128xf32>
      %c1_36 = arith.constant 1 : index
      %c0_37 = arith.constant 0 : index
      %46 = vector.load %arg11[%c1_36, %c0_37] : memref<16x128xf32, #tpu.memory_space<vmem>>, vector<1x128xf32>
      tpu.vector_store %arg11[%c1_36, %c0_37], %45 {strides = array<i32>} : memref<16x128xf32, #tpu.memory_space<vmem>>, vector<1x128xf32>,
      %c1_i32_38 = arith.constant 1 : i32
      %47 = arith.addi %37, %c1_i32_38 : i32
      %48 = arith.index_cast %47 : i32 to index
      %49 = memref.load %arg1[%48] : memref<48xi32, #tpu.memory_space<smem>>
      %50 = arith.index_cast %49 : i32 to index
      %c0_39 = arith.constant 0 : index
      %51 = vector.load %arg8[%50, %c0_39] : memref<32x128xf32, #tpu.memory_space<vmem>>, vector<1x128xf32>
      %c9 = arith.constant 9 : index
      %c0_40 = arith.constant 0 : index
      %52 = vector.load %arg10[%c9, %c0_40] : memref<16x128xf32, #tpu.memory_space<vmem>>, vector<1x128xf32>
      tpu.vector_store %arg10[%c9, %c0_40], %51 {strides = array<i32>} : memref<16x128xf32, #tpu.memory_space<vmem>>, vector<1x128xf32>,
      %53 = arith.index_cast %49 : i32 to index
      %c0_41 = arith.constant 0 : index
      %54 = vector.load %arg7[%53, %c0_41] : memref<32x128xf32, #tpu.memory_space<vmem>>, vector<1x128xf32>
      %c9_42 = arith.constant 9 : index
      %c0_43 = arith.constant 0 : index
      %55 = vector.load %arg11[%c9_42, %c0_43] : memref<16x128xf32, #tpu.memory_space<vmem>>, vector<1x128xf32>
      tpu.vector_store %arg11[%c9_42, %c0_43], %54 {strides = array<i32>} : memref<16x128xf32, #tpu.memory_space<vmem>>, vector<1x128xf32>,
      %c8_i32_44 = arith.constant 8 : i32
      %56 = arith.muli %arg12, %c8_i32_44 : i32
      %c2_i32_45 = arith.constant 2 : i32
      %57 = arith.addi %56, %c2_i32_45 : i32
      %c2_i32_46 = arith.constant 2 : i32
      %58 = arith.muli %57, %c2_i32_46 : i32
      %c0_i32_47 = arith.constant 0 : i32
      %59 = arith.addi %58, %c0_i32_47 : i32
      %60 = arith.index_cast %59 : i32 to index
      %61 = memref.load %arg1[%60] : memref<48xi32, #tpu.memory_space<smem>>
      %62 = arith.index_cast %61 : i32 to index
      %c0_48 = arith.constant 0 : index
      %63 = vector.load %arg8[%62, %c0_48] : memref<32x128xf32, #tpu.memory_space<vmem>>, vector<1x128xf32>
      %c2 = arith.constant 2 : index
      %c0_49 = arith.constant 0 : index
      %64 = vector.load %arg10[%c2, %c0_49] : memref<16x128xf32, #tpu.memory_space<vmem>>, vector<1x128xf32>
      tpu.vector_store %arg10[%c2, %c0_49], %63 {strides = array<i32>} : memref<16x128xf32, #tpu.memory_space<vmem>>, vector<1x128xf32>,
      %65 = arith.index_cast %61 : i32 to index
      %c0_50 = arith.constant 0 : index
      %66 = vector.load %arg7[%65, %c0_50] : memref<32x128xf32, #tpu.memory_space<vmem>>, vector<1x128xf32>
      %c2_51 = arith.constant 2 : index
      %c0_52 = arith.constant 0 : index
      %67 = vector.load %arg11[%c2_51, %c0_52] : memref<16x128xf32, #tpu.memory_space<vmem>>, vector<1x128xf32>
      tpu.vector_store %arg11[%c2_51, %c0_52], %66 {strides = array<i32>} : memref<16x128xf32, #tpu.memory_space<vmem>>, vector<1x128xf32>,
      %c1_i32_53 = arith.constant 1 : i32
      %68 = arith.addi %58, %c1_i32_53 : i32
      %69 = arith.index_cast %68 : i32 to index
      %70 = memref.load %arg1[%69] : memref<48xi32, #tpu.memory_space<smem>>
      %71 = arith.index_cast %70 : i32 to index
      %c0_54 = arith.constant 0 : index
      %72 = vector.load %arg8[%71, %c0_54] : memref<32x128xf32, #tpu.memory_space<vmem>>, vector<1x128xf32>
      %c10 = arith.constant 10 : index
      %c0_55 = arith.constant 0 : index
      %73 = vector.load %arg10[%c10, %c0_55] : memref<16x128xf32, #tpu.memory_space<vmem>>, vector<1x128xf32>
      tpu.vector_store %arg10[%c10, %c0_55], %72 {strides = array<i32>} : memref<16x128xf32, #tpu.memory_space<vmem>>, vector<1x128xf32>,
      %74 = arith.index_cast %70 : i32 to index
      %c0_56 = arith.constant 0 : index
      %75 = vector.load %arg7[%74, %c0_56] : memref<32x128xf32, #tpu.memory_space<vmem>>, vector<1x128xf32>
      %c10_57 = arith.constant 10 : index
      %c0_58 = arith.constant 0 : index
      %76 = vector.load %arg11[%c10_57, %c0_58] : memref<16x128xf32, #tpu.memory_space<vmem>>, vector<1x128xf32>
      tpu.vector_store %arg11[%c10_57, %c0_58], %75 {strides = array<i32>} : memref<16x128xf32, #tpu.memory_space<vmem>>, vector<1x128xf32>,
      %c8_i32_59 = arith.constant 8 : i32
      %77 = arith.muli %arg12, %c8_i32_59 : i32
      %c3_i32_60 = arith.constant 3 : i32
      %78 = arith.addi %77, %c3_i32_60 : i32
      %c2_i32_61 = arith.constant 2 : i32
      %79 = arith.muli %78, %c2_i32_61 : i32
      %c0_i32_62 = arith.constant 0 : i32
      %80 = arith.addi %79, %c0_i32_62 : i32
      %81 = arith.index_cast %80 : i32 to index
      %82 = memref.load %arg1[%81] : memref<48xi32, #tpu.memory_space<smem>>
      %83 = arith.index_cast %82 : i32 to index
      %c0_63 = arith.constant 0 : index
      %84 = vector.load %arg8[%83, %c0_63] : memref<32x128xf32, #tpu.memory_space<vmem>>, vector<1x128xf32>
      %c3 = arith.constant 3 : index
      %c0_64 = arith.constant 0 : index
      %85 = vector.load %arg10[%c3, %c0_64] : memref<16x128xf32, #tpu.memory_space<vmem>>, vector<1x128xf32>
      tpu.vector_store %arg10[%c3, %c0_64], %84 {strides = array<i32>} : memref<16x128xf32, #tpu.memory_space<vmem>>, vector<1x128xf32>,
      %86 = arith.index_cast %82 : i32 to index
      %c0_65 = arith.constant 0 : index
      %87 = vector.load %arg7[%86, %c0_65] : memref<32x128xf32, #tpu.memory_space<vmem>>, vector<1x128xf32>
      %c3_66 = arith.constant 3 : index
      %c0_67 = arith.constant 0 : index
      %88 = vector.load %arg11[%c3_66, %c0_67] : memref<16x128xf32, #tpu.memory_space<vmem>>, vector<1x128xf32>
      tpu.vector_store %arg11[%c3_66, %c0_67], %87 {strides = array<i32>} : memref<16x128xf32, #tpu.memory_space<vmem>>, vector<1x128xf32>,
      %c1_i32_68 = arith.constant 1 : i32
      %89 = arith.addi %79, %c1_i32_68 : i32
      %90 = arith.index_cast %89 : i32 to index
      %91 = memref.load %arg1[%90] : memref<48xi32, #tpu.memory_space<smem>>
      %92 = arith.index_cast %91 : i32 to index
      %c0_69 = arith.constant 0 : index
      %93 = vector.load %arg8[%92, %c0_69] : memref<32x128xf32, #tpu.memory_space<vmem>>, vector<1x128xf32>
      %c11 = arith.constant 11 : index
      %c0_70 = arith.constant 0 : index
      %94 = vector.load %arg10[%c11, %c0_70] : memref<16x128xf32, #tpu.memory_space<vmem>>, vector<1x128xf32>
      tpu.vector_store %arg10[%c11, %c0_70], %93 {strides = array<i32>} : memref<16x128xf32, #tpu.memory_space<vmem>>, vector<1x128xf32>,
      %95 = arith.index_cast %91 : i32 to index
      %c0_71 = arith.constant 0 : index
      %96 = vector.load %arg7[%95, %c0_71] : memref<32x128xf32, #tpu.memory_space<vmem>>, vector<1x128xf32>
      %c11_72 = arith.constant 11 : index
      %c0_73 = arith.constant 0 : index
      %97 = vector.load %arg11[%c11_72, %c0_73] : memref<16x128xf32, #tpu.memory_space<vmem>>, vector<1x128xf32>
      tpu.vector_store %arg11[%c11_72, %c0_73], %96 {strides = array<i32>} : memref<16x128xf32, #tpu.memory_space<vmem>>, vector<1x128xf32>,
      %c8_i32_74 = arith.constant 8 : i32
      %98 = arith.muli %arg12, %c8_i32_74 : i32
      %c4_i32 = arith.constant 4 : i32
      %99 = arith.addi %98, %c4_i32 : i32
      %c2_i32_75 = arith.constant 2 : i32
      %100 = arith.muli %99, %c2_i32_75 : i32
      %c0_i32_76 = arith.constant 0 : i32
      %101 = arith.addi %100, %c0_i32_76 : i32
      %102 = arith.index_cast %101 : i32 to index
      %103 = memref.load %arg1[%102] : memref<48xi32, #tpu.memory_space<smem>>
      %104 = arith.index_cast %103 : i32 to index
      %c0_77 = arith.constant 0 : index
      %105 = vector.load %arg8[%104, %c0_77] : memref<32x128xf32, #tpu.memory_space<vmem>>, vector<1x128xf32>
      %c4 = arith.constant 4 : index
      %c0_78 = arith.constant 0 : index
      %106 = vector.load %arg10[%c4, %c0_78] : memref<16x128xf32, #tpu.memory_space<vmem>>, vector<1x128xf32>
      tpu.vector_store %arg10[%c4, %c0_78], %105 {strides = array<i32>} : memref<16x128xf32, #tpu.memory_space<vmem>>, vector<1x128xf32>,
      %107 = arith.index_cast %103 : i32 to index
      %c0_79 = arith.constant 0 : index
      %108 = vector.load %arg7[%107, %c0_79] : memref<32x128xf32, #tpu.memory_space<vmem>>, vector<1x128xf32>
      %c4_80 = arith.constant 4 : index
      %c0_81 = arith.constant 0 : index
      %109 = vector.load %arg11[%c4_80, %c0_81] : memref<16x128xf32, #tpu.memory_space<vmem>>, vector<1x128xf32>
      tpu.vector_store %arg11[%c4_80, %c0_81], %108 {strides = array<i32>} : memref<16x128xf32, #tpu.memory_space<vmem>>, vector<1x128xf32>,
      %c1_i32_82 = arith.constant 1 : i32
      %110 = arith.addi %100, %c1_i32_82 : i32
      %111 = arith.index_cast %110 : i32 to index
      %112 = memref.load %arg1[%111] : memref<48xi32, #tpu.memory_space<smem>>
      %113 = arith.index_cast %112 : i32 to index
      %c0_83 = arith.constant 0 : index
      %114 = vector.load %arg8[%113, %c0_83] : memref<32x128xf32, #tpu.memory_space<vmem>>, vector<1x128xf32>
      %c12 = arith.constant 12 : index
      %c0_84 = arith.constant 0 : index
      %115 = vector.load %arg10[%c12, %c0_84] : memref<16x128xf32, #tpu.memory_space<vmem>>, vector<1x128xf32>
      tpu.vector_store %arg10[%c12, %c0_84], %114 {strides = array<i32>} : memref<16x128xf32, #tpu.memory_space<vmem>>, vector<1x128xf32>,
      %116 = arith.index_cast %112 : i32 to index
      %c0_85 = arith.constant 0 : index
      %117 = vector.load %arg7[%116, %c0_85] : memref<32x128xf32, #tpu.memory_space<vmem>>, vector<1x128xf32>
      %c12_86 = arith.constant 12 : index
      %c0_87 = arith.constant 0 : index
      %118 = vector.load %arg11[%c12_86, %c0_87] : memref<16x128xf32, #tpu.memory_space<vmem>>, vector<1x128xf32>
      tpu.vector_store %arg11[%c12_86, %c0_87], %117 {strides = array<i32>} : memref<16x128xf32, #tpu.memory_space<vmem>>, vector<1x128xf32>,
      %c8_i32_88 = arith.constant 8 : i32
      %119 = arith.muli %arg12, %c8_i32_88 : i32
      %c5_i32 = arith.constant 5 : i32
      %120 = arith.addi %119, %c5_i32 : i32
      %c2_i32_89 = arith.constant 2 : i32
      %121 = arith.muli %120, %c2_i32_89 : i32
      %c0_i32_90 = arith.constant 0 : i32
      %122 = arith.addi %121, %c0_i32_90 : i32
      %123 = arith.index_cast %122 : i32 to index
      %124 = memref.load %arg1[%123] : memref<48xi32, #tpu.memory_space<smem>>
      %125 = arith.index_cast %124 : i32 to index
      %c0_91 = arith.constant 0 : index
      %126 = vector.load %arg8[%125, %c0_91] : memref<32x128xf32, #tpu.memory_space<vmem>>, vector<1x128xf32>
      %c5 = arith.constant 5 : index
      %c0_92 = arith.constant 0 : index
      %127 = vector.load %arg10[%c5, %c0_92] : memref<16x128xf32, #tpu.memory_space<vmem>>, vector<1x128xf32>
      tpu.vector_store %arg10[%c5, %c0_92], %126 {strides = array<i32>} : memref<16x128xf32, #tpu.memory_space<vmem>>, vector<1x128xf32>,
      %128 = arith.index_cast %124 : i32 to index
      %c0_93 = arith.constant 0 : index
      %129 = vector.load %arg7[%128, %c0_93] : memref<32x128xf32, #tpu.memory_space<vmem>>, vector<1x128xf32>
      %c5_94 = arith.constant 5 : index
      %c0_95 = arith.constant 0 : index
      %130 = vector.load %arg11[%c5_94, %c0_95] : memref<16x128xf32, #tpu.memory_space<vmem>>, vector<1x128xf32>
      tpu.vector_store %arg11[%c5_94, %c0_95], %129 {strides = array<i32>} : memref<16x128xf32, #tpu.memory_space<vmem>>, vector<1x128xf32>,
      %c1_i32_96 = arith.constant 1 : i32
      %131 = arith.addi %121, %c1_i32_96 : i32
      %132 = arith.index_cast %131 : i32 to index
      %133 = memref.load %arg1[%132] : memref<48xi32, #tpu.memory_space<smem>>
      %134 = arith.index_cast %133 : i32 to index
      %c0_97 = arith.constant 0 : index
      %135 = vector.load %arg8[%134, %c0_97] : memref<32x128xf32, #tpu.memory_space<vmem>>, vector<1x128xf32>
      %c13 = arith.constant 13 : index
      %c0_98 = arith.constant 0 : index
      %136 = vector.load %arg10[%c13, %c0_98] : memref<16x128xf32, #tpu.memory_space<vmem>>, vector<1x128xf32>
      tpu.vector_store %arg10[%c13, %c0_98], %135 {strides = array<i32>} : memref<16x128xf32, #tpu.memory_space<vmem>>, vector<1x128xf32>,
      %137 = arith.index_cast %133 : i32 to index
      %c0_99 = arith.constant 0 : index
      %138 = vector.load %arg7[%137, %c0_99] : memref<32x128xf32, #tpu.memory_space<vmem>>, vector<1x128xf32>
      %c13_100 = arith.constant 13 : index
      %c0_101 = arith.constant 0 : index
      %139 = vector.load %arg11[%c13_100, %c0_101] : memref<16x128xf32, #tpu.memory_space<vmem>>, vector<1x128xf32>
      tpu.vector_store %arg11[%c13_100, %c0_101], %138 {strides = array<i32>} : memref<16x128xf32, #tpu.memory_space<vmem>>, vector<1x128xf32>,
      %c8_i32_102 = arith.constant 8 : i32
      %140 = arith.muli %arg12, %c8_i32_102 : i32
      %c6_i32 = arith.constant 6 : i32
      %141 = arith.addi %140, %c6_i32 : i32
      %c2_i32_103 = arith.constant 2 : i32
      %142 = arith.muli %141, %c2_i32_103 : i32
      %c0_i32_104 = arith.constant 0 : i32
      %143 = arith.addi %142, %c0_i32_104 : i32
      %144 = arith.index_cast %143 : i32 to index
      %145 = memref.load %arg1[%144] : memref<48xi32, #tpu.memory_space<smem>>
      %146 = arith.index_cast %145 : i32 to index
      %c0_105 = arith.constant 0 : index
      %147 = vector.load %arg8[%146, %c0_105] : memref<32x128xf32, #tpu.memory_space<vmem>>, vector<1x128xf32>
      %c6 = arith.constant 6 : index
      %c0_106 = arith.constant 0 : index
      %148 = vector.load %arg10[%c6, %c0_106] : memref<16x128xf32, #tpu.memory_space<vmem>>, vector<1x128xf32>
      tpu.vector_store %arg10[%c6, %c0_106], %147 {strides = array<i32>} : memref<16x128xf32, #tpu.memory_space<vmem>>, vector<1x128xf32>,
      %149 = arith.index_cast %145 : i32 to index
      %c0_107 = arith.constant 0 : index
      %150 = vector.load %arg7[%149, %c0_107] : memref<32x128xf32, #tpu.memory_space<vmem>>, vector<1x128xf32>
      %c6_108 = arith.constant 6 : index
      %c0_109 = arith.constant 0 : index
      %151 = vector.load %arg11[%c6_108, %c0_109] : memref<16x128xf32, #tpu.memory_space<vmem>>, vector<1x128xf32>
      tpu.vector_store %arg11[%c6_108, %c0_109], %150 {strides = array<i32>} : memref<16x128xf32, #tpu.memory_space<vmem>>, vector<1x128xf32>,
      %c1_i32_110 = arith.constant 1 : i32
      %152 = arith.addi %142, %c1_i32_110 : i32
      %153 = arith.index_cast %152 : i32 to index
      %154 = memref.load %arg1[%153] : memref<48xi32, #tpu.memory_space<smem>>
      %155 = arith.index_cast %154 : i32 to index
      %c0_111 = arith.constant 0 : index
      %156 = vector.load %arg8[%155, %c0_111] : memref<32x128xf32, #tpu.memory_space<vmem>>, vector<1x128xf32>
      %c14 = arith.constant 14 : index
      %c0_112 = arith.constant 0 : index
      %157 = vector.load %arg10[%c14, %c0_112] : memref<16x128xf32, #tpu.memory_space<vmem>>, vector<1x128xf32>
      tpu.vector_store %arg10[%c14, %c0_112], %156 {strides = array<i32>} : memref<16x128xf32, #tpu.memory_space<vmem>>, vector<1x128xf32>,
      %158 = arith.index_cast %154 : i32 to index
      %c0_113 = arith.constant 0 : index
      %159 = vector.load %arg7[%158, %c0_113] : memref<32x128xf32, #tpu.memory_space<vmem>>, vector<1x128xf32>
      %c14_114 = arith.constant 14 : index
      %c0_115 = arith.constant 0 : index
      %160 = vector.load %arg11[%c14_114, %c0_115] : memref<16x128xf32, #tpu.memory_space<vmem>>, vector<1x128xf32>
      tpu.vector_store %arg11[%c14_114, %c0_115], %159 {strides = array<i32>} : memref<16x128xf32, #tpu.memory_space<vmem>>, vector<1x128xf32>,
      %c8_i32_116 = arith.constant 8 : i32
      %161 = arith.muli %arg12, %c8_i32_116 : i32
      %c7_i32 = arith.constant 7 : i32
      %162 = arith.addi %161, %c7_i32 : i32
      %c2_i32_117 = arith.constant 2 : i32
      %163 = arith.muli %162, %c2_i32_117 : i32
      %c0_i32_118 = arith.constant 0 : i32
      %164 = arith.addi %163, %c0_i32_118 : i32
      %165 = arith.index_cast %164 : i32 to index
      %166 = memref.load %arg1[%165] : memref<48xi32, #tpu.memory_space<smem>>
      %167 = arith.index_cast %166 : i32 to index
      %c0_119 = arith.constant 0 : index
      %168 = vector.load %arg8[%167, %c0_119] : memref<32x128xf32, #tpu.memory_space<vmem>>, vector<1x128xf32>
      %c7 = arith.constant 7 : index
      %c0_120 = arith.constant 0 : index
      %169 = vector.load %arg10[%c7, %c0_120] : memref<16x128xf32, #tpu.memory_space<vmem>>, vector<1x128xf32>
      tpu.vector_store %arg10[%c7, %c0_120], %168 {strides = array<i32>} : memref<16x128xf32, #tpu.memory_space<vmem>>, vector<1x128xf32>,
      %170 = arith.index_cast %166 : i32 to index
      %c0_121 = arith.constant 0 : index
      %171 = vector.load %arg7[%170, %c0_121] : memref<32x128xf32, #tpu.memory_space<vmem>>, vector<1x128xf32>
      %c7_122 = arith.constant 7 : index
      %c0_123 = arith.constant 0 : index
      %172 = vector.load %arg11[%c7_122, %c0_123] : memref<16x128xf32, #tpu.memory_space<vmem>>, vector<1x128xf32>
      tpu.vector_store %arg11[%c7_122, %c0_123], %171 {strides = array<i32>} : memref<16x128xf32, #tpu.memory_space<vmem>>, vector<1x128xf32>,
      %c1_i32_124 = arith.constant 1 : i32
      %173 = arith.addi %163, %c1_i32_124 : i32
      %174 = arith.index_cast %173 : i32 to index
      %175 = memref.load %arg1[%174] : memref<48xi32, #tpu.memory_space<smem>>
      %176 = arith.index_cast %175 : i32 to index
      %c0_125 = arith.constant 0 : index
      %177 = vector.load %arg8[%176, %c0_125] : memref<32x128xf32, #tpu.memory_space<vmem>>, vector<1x128xf32>
      %c15 = arith.constant 15 : index
      %c0_126 = arith.constant 0 : index
      %178 = vector.load %arg10[%c15, %c0_126] : memref<16x128xf32, #tpu.memory_space<vmem>>, vector<1x128xf32>
      tpu.vector_store %arg10[%c15, %c0_126], %177 {strides = array<i32>} : memref<16x128xf32, #tpu.memory_space<vmem>>, vector<1x128xf32>,
      %179 = arith.index_cast %175 : i32 to index
      %c0_127 = arith.constant 0 : index
      %180 = vector.load %arg7[%179, %c0_127] : memref<32x128xf32, #tpu.memory_space<vmem>>, vector<1x128xf32>
      %c15_128 = arith.constant 15 : index
      %c0_129 = arith.constant 0 : index
      %181 = vector.load %arg11[%c15_128, %c0_129] : memref<16x128xf32, #tpu.memory_space<vmem>>, vector<1x128xf32>
      tpu.vector_store %arg11[%c15_128, %c0_129], %180 {strides = array<i32>} : memref<16x128xf32, #tpu.memory_space<vmem>>, vector<1x128xf32>,
      %c0_130 = arith.constant 0 : index
      %c0_131 = arith.constant 0 : index
      %182 = vector.load %arg10[%c0_130, %c0_131] : memref<16x128xf32, #tpu.memory_space<vmem>>, vector<16x128xf32>
      %c0_132 = arith.constant 0 : index
      %c0_133 = arith.constant 0 : index
      %183 = vector.load %arg11[%c0_132, %c0_133] : memref<16x128xf32, #tpu.memory_space<vmem>>, vector<16x128xf32>
      %184 = vector.extract_strided_slice %182 {offsets = [0, 0], sizes = [8, 128], strides = [1, 1]} : vector<16x128xf32> to vector<8x128xf32>
      %185 = vector.extract_strided_slice %182 {offsets = [8, 0], sizes = [8, 128], strides = [1, 1]} : vector<16x128xf32> to vector<8x128xf32>
      %186 = arith.addf %184, %185 : vector<8x128xf32>
      %187 = arith.index_cast %13 : i32 to index
      %c0_134 = arith.constant 0 : index
      %188 = vector.load %arg9[%187, %c0_134] : memref<24x512xf32, #tpu.memory_space<vmem>>, vector<8x512xf32>
      %189 = vector.extract_strided_slice %188 {offsets = [0, 0], sizes = [8, 384], strides = [1, 1]} : vector<8x512xf32> to vector<8x384xf32>
      %c0_135 = arith.constant 0 : index
      %c0_136 = arith.constant 0 : index
      %190 = vector.load %arg5[%c0_135, %c0_136] : memref<128x384xf32, #tpu.memory_space<vmem>>, vector<128x384xf32>
      %cst_137 = arith.constant dense<0.000000e+00> : vector<8x384xf32>
      %191 = tpu.matmul %186, %190, %cst_137 {dimension_numbers = #tpu.dot_dimension_numbers<[1], [0], [0], [1], [0, 0, 1, 1], [], []>} : vector<8x128xf32>, vector<128x384xf32>, vector<8x384xf32> -> vector<8x384xf32>
      %192 = arith.addf %189, %191 : vector<8x384xf32>
      %193 = vector.extract_strided_slice %192 {offsets = [0, 0], sizes = [8, 128], strides = [1, 1]} : vector<8x384xf32> to vector<8x128xf32>
      %194 = arith.negf %193 : vector<8x128xf32>
      %195 = math.exp %194 : vector<8x128xf32>
      %cst_138 = arith.constant 1.000000e+00 : f32
      %196 = vector.broadcast %cst_138 : f32 to vector<8x128xf32>
      %197 = arith.addf %196, %195 : vector<8x128xf32>
      %198 = arith.divf %196, %197 : vector<8x128xf32>
      %199 = vector.extract_strided_slice %192 {offsets = [0, 128], sizes = [8, 128], strides = [1, 1]} : vector<8x384xf32> to vector<8x128xf32>
      %200 = arith.negf %199 : vector<8x128xf32>
      %201 = math.exp %200 : vector<8x128xf32>
      %cst_139 = arith.constant 1.000000e+00 : f32
      %202 = vector.broadcast %cst_139 : f32 to vector<8x128xf32>
      %203 = arith.addf %202, %201 : vector<8x128xf32>
      %204 = arith.divf %202, %203 : vector<8x128xf32>
      %205 = vector.extract_strided_slice %192 {offsets = [0, 256], sizes = [8, 128], strides = [1, 1]} : vector<8x384xf32> to vector<8x128xf32>
      %206 = math.tanh %205 : vector<8x128xf32>
      %207 = vector.extract_strided_slice %188 {offsets = [0, 384], sizes = [8, 128], strides = [1, 1]} : vector<8x512xf32> to vector<8x128xf32>
      %c0_140 = arith.constant 0 : index
      %c0_141 = arith.constant 0 : index
      %208 = vector.load %arg6[%c0_140, %c0_141] : memref<128x128xf32, #tpu.memory_space<vmem>>, vector<128x128xf32>
      %cst_142 = arith.constant dense<0.000000e+00> : vector<16x128xf32>
      %209 = tpu.matmul %182, %208, %cst_142 {dimension_numbers = #tpu.dot_dimension_numbers<[1], [0], [0], [1], [0, 0, 1, 1], [], []>} : vector<16x128xf32>, vector<128x128xf32>, vector<16x128xf32> -> vector<16x128xf32>
      %210 = vector.extract_strided_slice %209 {offsets = [0, 0], sizes = [8, 128], strides = [1, 1]} : vector<16x128xf32> to vector<8x128xf32>
      %211 = arith.addf %210, %207 : vector<8x128xf32>
      %212 = arith.negf %211 : vector<8x128xf32>
      %213 = math.exp %212 : vector<8x128xf32>
      %cst_143 = arith.constant 1.000000e+00 : f32
      %214 = vector.broadcast %cst_143 : f32 to vector<8x128xf32>
      %215 = arith.addf %214, %213 : vector<8x128xf32>
      %216 = arith.divf %214, %215 : vector<8x128xf32>
      %217 = vector.extract_strided_slice %183 {offsets = [0, 0], sizes = [8, 128], strides = [1, 1]} : vector<16x128xf32> to vector<8x128xf32>
      %218 = arith.mulf %216, %217 : vector<8x128xf32>
      %219 = vector.extract_strided_slice %209 {offsets = [8, 0], sizes = [8, 128], strides = [1, 1]} : vector<16x128xf32> to vector<8x128xf32>
      %220 = arith.addf %219, %207 : vector<8x128xf32>
      %221 = arith.negf %220 : vector<8x128xf32>
      %222 = math.exp %221 : vector<8x128xf32>
      %cst_144 = arith.constant 1.000000e+00 : f32
      %223 = vector.broadcast %cst_144 : f32 to vector<8x128xf32>
      %224 = arith.addf %223, %222 : vector<8x128xf32>
      %225 = arith.divf %223, %224 : vector<8x128xf32>
      %226 = vector.extract_strided_slice %183 {offsets = [8, 0], sizes = [8, 128], strides = [1, 1]} : vector<16x128xf32> to vector<8x128xf32>
      %227 = arith.mulf %225, %226 : vector<8x128xf32>
      %228 = arith.addf %218, %227 : vector<8x128xf32>
      %229 = arith.mulf %198, %206 : vector<8x128xf32>
      %230 = arith.addf %229, %228 : vector<8x128xf32>
      %231 = math.tanh %230 : vector<8x128xf32>
      %232 = arith.mulf %204, %231 : vector<8x128xf32>
      %233 = arith.index_cast %13 : i32 to index
      %c0_145 = arith.constant 0 : index
      %234 = vector.load %arg7[%233, %c0_145] : memref<32x128xf32, #tpu.memory_space<vmem>>, vector<8x128xf32>
      tpu.vector_store %arg7[%233, %c0_145], %230 {strides = array<i32>} : memref<32x128xf32, #tpu.memory_space<vmem>>, vector<8x128xf32>,
      %235 = arith.index_cast %13 : i32 to index
      %c0_146 = arith.constant 0 : index
      %236 = vector.load %arg8[%235, %c0_146] : memref<32x128xf32, #tpu.memory_space<vmem>>, vector<8x128xf32>
      tpu.vector_store %arg8[%235, %c0_146], %232 {strides = array<i32>} : memref<32x128xf32, #tpu.memory_space<vmem>>, vector<8x128xf32>,
    }
    %c3_i32_13 = arith.constant 3 : i32
    return
  }
  func.func @transform_0(%arg0: i32, %arg1: memref<48xi32, #tpu.memory_space<smem>>) -> (i32, i32) {
    %c0_i32 = arith.constant 0 : i32
    %c0_i32_0 = arith.constant 0 : i32
    %c0_i32_1 = arith.constant 0 : i32
    return %c0_i32, %c0_i32_0 : i32, i32
  }
  func.func @transform_1(%arg0: i32, %arg1: memref<48xi32, #tpu.memory_space<smem>>) -> (i32, i32) {
    %c0_i32 = arith.constant 0 : i32
    %c0_i32_0 = arith.constant 0 : i32
    %c0_i32_1 = arith.constant 0 : i32
    return %c0_i32, %c0_i32_0 : i32, i32
  }
  func.func @transform_2(%arg0: i32, %arg1: memref<48xi32, #tpu.memory_space<smem>>) -> (i32, i32) {
    %c0_i32 = arith.constant 0 : i32
    %c0_i32_0 = arith.constant 0 : i32
    %c0_i32_1 = arith.constant 0 : i32
    return %c0_i32, %c0_i32_0 : i32, i32
  }
  func.func @transform_3(%arg0: i32, %arg1: memref<48xi32, #tpu.memory_space<smem>>) -> (i32, i32) {
    %c0_i32 = arith.constant 0 : i32
    %c0_i32_0 = arith.constant 0 : i32
    %c0_i32_1 = arith.constant 0 : i32
    return %c0_i32, %c0_i32_0 : i32, i32
  }
  func.func @transform_4(%arg0: i32, %arg1: memref<48xi32, #tpu.memory_space<smem>>) -> (i32, i32) {
    %c0_i32 = arith.constant 0 : i32
    %c0_i32_0 = arith.constant 0 : i32
    %c0_i32_1 = arith.constant 0 : i32
    return %c0_i32, %c0_i32_0 : i32, i32
  }
  func.func @transform_5(%arg0: i32, %arg1: memref<48xi32, #tpu.memory_space<smem>>) -> (i32, i32) {
    %c0_i32 = arith.constant 0 : i32
    %c0_i32_0 = arith.constant 0 : i32
    %c0_i32_1 = arith.constant 0 : i32
    return %c0_i32, %c0_i32_0 : i32, i32
  }
  func.func @transform_6(%arg0: i32, %arg1: memref<48xi32, #tpu.memory_space<smem>>) -> (i32, i32) {
    %c0_i32 = arith.constant 0 : i32
    %c0_i32_0 = arith.constant 0 : i32
    %c0_i32_1 = arith.constant 0 : i32
    return %c0_i32, %c0_i32_0 : i32, i32
  }
}

</mosaic_0001>

<bundles_post_ra>
// kernel: _tree_lstm_call.1
= control target key start
LH: loop header
LB: loop body
LE: loop exit
PB: predicated region body
PF: predicated region fallthrough
CT: control target
= control target key end

     0   :  { %s1509_s0 = inlined_call_operand.vmem [shape: s32[48], index: 0, kind: input, shape index: {}]   ;;  %s1510_s1 = inlined_call_operand.vmem [shape: f32[24,64], index: 1, kind: input, shape index: {}]   ;;  %s1511_s2 = inlined_call_operand.vmem [shape: f32[64,512], index: 2, kind: input, shape index: {}]   ;;  %s1512_s3 = inlined_call_operand.hbm [shape: f32[1,512], index: 3, kind: input, shape index: {}]   ;;  %s1513_s4 = inlined_call_operand.hbm [shape: f32[128,384], index: 4, kind: input, shape index: {}]   ;;  %s1514_s5 = inlined_call_operand.hbm [shape: f32[128,128], index: 5, kind: input, shape index: {}]   ;;  %s1515_s6 = inlined_call_operand.hbm [shape: f32[32,128], index: 6, kind: output, shape index: {0}]   ;;  %s1516_s7 = inlined_call_operand.hbm [shape: f32[32,128], index: 7, kind: output, shape index: {1}]  }
   0x1   :  { %s13_s26 = sshll.u32 %s1509_s0, 4  ;;  %s14_s26 = int_to_ptr.vmem [resolvable:$true] %s13_s26 }
   0x2   :  { %s1066_s27 = scalar_lea.vmem %s14_s26, 16  ;;  %p1071_p1 = scmp.lt.s32.totalorder %s14_s26, %s14_s26 }
   0x3   :  { %p1067_p0 = scmp.ne.s32.totalorder %s14_s26, %s1066_s27  ;;  %p1072_p2 = scmp.lt.s32.totalorder %s1066_s27, %s1066_s27 }
   0x5   :  { %p1073_p3 = por %p1072_p2, %p1071_p1 }
   0x7   :  { %p1074_p4 = pnand %p1073_p3, %p1067_p0 }
   0x9   :  { %1077 = shalt.err (!%p1074_p4)  }
   0xa   :  { %s1196_s28 = smov [#allocation6]  }
   0xb   :  { %16 = dma.vmem_to_smem %s14_s26, 16, %s1196_s28, [#allocation5] }
   0xc   :  { %1182 = dma.done.wait [#allocation5], 16 }
   0xd   :  { %1183 = vsyncadd [#allocation5], 4294967280 }
   0xe   :  { %18 = sfence }
   0xf   :  { %19 = vsyncpa [#allocation8], 0 }
  0x10   :  { %20 = vsyncpa [#allocation11], 0 }
  0x11   :  { %21 = vsyncpa [#allocation9], 0 }
  0x12   :  { %22 = vsyncpa [#allocation15], 0  ;;  %s1197_s29 = smov [#allocation10]  }
  0x13   :  { %s42_s30 = sshll.u32 %s1197_s29, 4  ;;  %s43_s30 = int_to_ptr.vmem [resolvable:$true] %s42_s30 }
  0x14   :  { %s1086_s0 = scalar_lea.vmem %s43_s30, 6144  ;;  %p1091_p6 = scmp.lt.s32.totalorder %s43_s30, %s43_s30 }
  0x15   :  { %p1087_p5 = scmp.ne.s32.totalorder %s43_s30, %s1086_s0  ;;  %p1092_p7 = scmp.lt.s32.totalorder %s1086_s0, %s1086_s0 }
  0x17   :  { %p1093_p8 = por %p1092_p7, %p1091_p6 }
  0x19   :  { %p1094_p9 = pnand %p1093_p8, %p1087_p5 }
  0x1b   :  { %1097 = shalt.err (!%p1094_p9)
}
  0x1c   :  { %s1198_s8 = smov 384   ;;  %s1199_s9 = smov 24  }
  0x1d   :  { %48 = dma.hbm_to_vmem [thread:$0]  %s1513_s4, 6144, %s43_s30, [#allocation11], %s1198_s8, %s1198_s8, %s1199_s9  }
  0x1e   :  { %s1200_s12 = smov [#allocation7]   ;;  %s1201_s14 = smov [#allocation12]  }
  0x1f   :  { %s33_s13 = sshll.u32 %s1200_s12, 4  ;;  %s54_s15 = sshll.u32 %s1201_s14, 4  ;;  %s34_s13 = int_to_ptr.vmem [resolvable:$true] %s33_s13  ;;  %s55_s15 = int_to_ptr.vmem [resolvable:$true] %s54_s15 }
  0x20   :  { %s1106_s16 = scalar_lea.vmem %s34_s13, 64  ;;  %p1111_p11 = scmp.lt.s32.totalorder %s34_s13, %s34_s13 }
  0x21   :  { %p1107_p10 = scmp.ne.s32.totalorder %s34_s13, %s1106_s16  ;;  %p1112_p12 = scmp.lt.s32.totalorder %s1106_s16, %s1106_s16 }
  0x23   :  { %p1113_p13 = por %p1112_p12, %p1111_p11 }
  0x25   :  { %p1114_p0 = pnand %p1113_p13, %p1107_p10 }
  0x27   :  { %1117 = shalt.err (!%p1114_p0)
}
  0x28   :  { %36 = dma.hbm_to_vmem [thread:$0]  %s1512_s3, 64, %s34_s13, [#allocation8]  }
  0x29   :  { %s1126_s19 = scalar_lea.vmem %s55_s15, 2048  ;;  %p1131_p2 = scmp.lt.s32.totalorder %s55_s15, %s55_s15 }
  0x2a   :  { %p1127_p1 = scmp.ne.s32.totalorder %s55_s15, %s1126_s19  ;;  %p1132_p3 = scmp.lt.s32.totalorder %s1126_s19, %s1126_s19 }
  0x2c   :  { %p1133_p4 = por %p1132_p3, %p1131_p2 }
  0x2e   :  { %p1134_p5 = pnand %p1133_p4, %p1127_p1 }
  0x30   :  { %1137 = shalt.err (!%p1134_p5)
}
  0x31   :  { %s1202_s4 = smov 128   ;;  %s1203_s20 = smov 8  }
  0x32   :  { %60 = dma.hbm_to_vmem [thread:$0]  %s1514_s5, 2048, %s55_s15, [#allocation11], %s1202_s4, %s1202_s4, %s1203_s20  }
  0x33   :  { %1184 = dma.done.wait [#allocation8], 64  }
  0x34   :  { %1185 = vsyncadd [#allocation8], 4294967232 }
  0x35   :  { %1186 = dma.done.wait [#allocation11], 8192  }
  0x36   :  { %1187 = vsyncadd [#allocation11], 4294959104  ;;  %v1204_v0 = vmov 0.0   ;;  %v110_v1 = vld [vmem:[%s1511_s2 + $0xe8] sm:$0xff]  ;;  %v112_v2 = vld [vmem:[%s1511_s2 + $0xf8] sm:$0xff]  ;;  %vm135_vm0 = vcmask 523264   ;;  %v115_v36 = vlaneseq }
  0x37   :  { %70 = vst [vmem:[#allocation13] sm:$0xff] %v1204_v0  ;;  %71 = vst [vmem:[#allocation13 + $0x8] sm:$0xff] %v1204_v0  ;;  %209 = vmatprep.mubr.f32.mxu0 %v1204_v0  ;;  %292 = vmatprep.mubr.f32.mxu1 %v1204_v0  ;;  %v109_v3 = vld [vmem:[%s1511_s2 + $0xe0] sm:$0xff]  ;;  %v111_v4 = vld [vmem:[%s1511_s2 + $0xf0] sm:$0xff] }
  0x38   :  { %72 = vst [vmem:[#allocation13 + $0x10] sm:$0xff] %v1204_v0  ;;  %73 = vst [vmem:[#allocation13 + $0x18] sm:$0xff] %v1204_v0  ;;  %161 = vmatprep.subr.mxu0 %v110_v1  ;;  %244 = vmatprep.subr.mxu1 %v112_v2  ;;  %v106_v5 = vld [vmem:[%s1511_s2 + $0xc8] sm:$0xff]  ;;  %v108_v6 = vld [vmem:[%s1511_s2 + $0xd8] sm:$0xff]  ;;  %v116_v37 = vshrl.u32 %v115_v36, 7 }
  0x39   :  { %74 = vst [vmem:[#allocation14] sm:$0xff] %v1204_v0  ;;  %75 = vst [vmem:[#allocation14 + $0x8] sm:$0xff] %v1204_v0  ;;  %162 = vmatpush1.msra.mxu0 %v109_v3  ;;  %245 = vmatpush1.msra.mxu1 %v111_v4  ;;  %v105_v7 = vld [vmem:[%s1511_s2 + $0xc0] sm:$0xff]  ;;  %v107_v8 = vld [vmem:[%s1511_s2 + $0xd0] sm:$0xff] }
  0x3a   :  { %76 = vst [vmem:[#allocation14 + $0x10] sm:$0xff] %v1204_v0  ;;  %77 = vst [vmem:[#allocation14 + $0x18] sm:$0xff] %v1204_v0  ;;  %v102_v9 = vld [vmem:[%s1511_s2 + $0xa8] sm:$0xff]  ;;  %163 = vmatprep.subr.mxu0 %v106_v5  ;;  %246 = vmatprep.subr.mxu1 %v108_v6  ;;  %v104_v10 = vld [vmem:[%s1511_s2 + $0xb8] sm:$0xff]  ;;  %v117_v38 = vsub.s32 0, %v116_v37  ;;  %v125_v39 = vsub.s32 2, %v116_v37 }
  0x3b   :  { %v101_v11 = vld [vmem:[%s1511_s2 + $0xa0] sm:$0xff]  ;;  %v103_v12 = vld [vmem:[%s1511_s2 + $0xb0] sm:$0xff]  ;;  %164 = vmatpush1.msra.mxu0 %v105_v7  ;;  %247 = vmatpush1.msra.mxu1 %v107_v8  ;;  %v98_v13 = vld [vmem:[%s1511_s2 + $0x88] sm:$0xff]  ;;  %v121_v41 = vsub.s32 1, %v116_v37  ;;  %v129_v42 = vsub.s32 3, %v116_v37 }
  0x3c   :  { %v100_v14 = vld [vmem:[%s1511_s2 + $0x98] sm:$0xff]  ;;  %165 = vmatprep.subr.mxu0 %v102_v9  ;;  %248 = vmatprep.subr.mxu1 %v104_v10  ;;  %v97_v15 = vld [vmem:[%s1511_s2 + $0x80] sm:$0xff]  ;;  %v99_v16 = vld [vmem:[%s1511_s2 + $0x90] sm:$0xff] }
  0x3d   :  { %166 = vmatpush1.msra.mxu0 %v101_v11  ;;  %249 = vmatpush1.msra.mxu1 %v103_v12  ;;  %v94_v17 = vld [vmem:[%s1511_s2 + $0x68] sm:$0xff]  ;;  %v96_v18 = vld [vmem:[%s1511_s2 + $0x78] sm:$0xff]  ;;  %v93_v19 = vld [vmem:[%s1511_s2 + $0x60] sm:$0xff] }
  0x3e   :  { %167 = vmatprep.subr.mxu0 %v98_v13  ;;  %250 = vmatprep.subr.mxu1 %v100_v14  ;;  %v95_v20 = vld [vmem:[%s1511_s2 + $0x70] sm:$0xff]  ;;  %v90_v21 = vld [vmem:[%s1511_s2 + $0x48] sm:$0xff]  ;;  %v92_v22 = vld [vmem:[%s1511_s2 + $0x58] sm:$0xff] }
  0x3f   :  { %168 = vmatpush1.msra.mxu0 %v97_v15  ;;  %251 = vmatpush1.msra.mxu1 %v99_v16  ;;  %v89_v23 = vld [vmem:[%s1511_s2 + $0x40] sm:$0xff]  ;;  %v91_v24 = vld [vmem:[%s1511_s2 + $0x50] sm:$0xff]  ;;  %v86_v25 = vld [vmem:[%s1511_s2 + $0x28] sm:$0xff] }
  0x40   :  { %169 = vmatprep.subr.mxu0 %v94_v17  ;;  %252 = vmatprep.subr.mxu1 %v96_v18  ;;  %v88_v26 = vld [vmem:[%s1511_s2 + $0x38] sm:$0xff]  ;;  %v85_v27 = vld [vmem:[%s1511_s2 + $0x20] sm:$0xff]  ;;  %v87_v28 = vld [vmem:[%s1511_s2 + $0x30] sm:$0xff] }
  0x41   :  { %170 = vmatpush1.msra.mxu0 %v93_v19  ;;  %253 = vmatpush1.msra.mxu1 %v95_v20  ;;  %v82_v29 = vld [vmem:[%s1511_s2 + $0x8] sm:$0xff]  ;;  %v84_v30 = vld [vmem:[%s1511_s2 + $0x18] sm:$0xff]  ;;  %v81_v31 = vld [vmem:[%s1511_s2] sm:$0xff] }
  0x42   :  { %171 = vmatprep.subr.mxu0 %v90_v21  ;;  %254 = vmatprep.subr.mxu1 %v92_v22  ;;  %v83_v32 = vld [vmem:[%s1511_s2 + $0x10] sm:$0xff]  ;;  %v78_v33 = vld [vmem:[%s1510_s1] sm:$0xff]  ;;  %v79_v34 = vld [vmem:[%s1510_s1 + $0x8] sm:$0xff] }
  0x43   :  { %172 = vmatpush1.msra.mxu0 %v89_v23  ;;  %255 = vmatpush1.msra.mxu1 %v91_v24  ;;  %v80_v35 = vld [vmem:[%s1510_s1 + $0x10] sm:$0xff]  ;;  %v113_v40 = vld [vmem:[#allocation7] sm:$0xf]  ;;  %s1389_s1 = smov 0  }
  0x44   :  { %173 = vmatprep.subr.mxu0 %v86_v25  ;;  %256 = vmatprep.subr.mxu1 %v88_v26  ;;  %v118_v43 = vrot.slane %v113_v40, %v117_v38  ;;  %v126_v44 = vrot.slane %v113_v40, %v125_v39  ;;  %v122_v45 = vrot.slane %v113_v40, %v121_v41 }
  0x45   :  { %174 = vmatpush1.msra.mxu0 %v85_v27  ;;  %257 = vmatpush1.msra.mxu1 %v87_v28  ;;  %v130_v46 = vrot.slane %v113_v40, %v129_v42 }
  0x46   :  { %175 = vmatprep.subr.mxu0 %v82_v29  ;;  %258 = vmatprep.subr.mxu1 %v84_v30 }
  0x47   :  { %176 = vmatpush1.msra.mxu0 %v81_v31  ;;  %259 = vmatpush1.msra.mxu1 %v83_v32 }
  0x48   :  { %877 = vmatmul.mubr.msk.f32.vlgmr.msra.gmra.mxu0 %vm135_vm0, %v78_v33  ;;  %880 = vmatmul.mubr.msk.f32.vlgmr.msra.gmra.mxu1 %vm135_vm0, %v78_v33 }
  0x49   :  { %215 = vmatprep.mubr.f32.mxu0 %v1204_v0  ;;  %298 = vmatprep.mubr.f32.mxu1 %v1204_v0 }
  0x4c   :  { %878 = vmatmul.mubr.msk.f32.gmra.mxu0 %vm135_vm0, %v79_v34  ;;  %881 = vmatmul.mubr.msk.f32.gmra.mxu1 %vm135_vm0, %v79_v34 }
  0x4d   :  { %221 = vmatprep.mubr.f32.mxu0 %v1204_v0  ;;  %304 = vmatprep.mubr.f32.mxu1 %v1204_v0 }
  0x50   :  { %879 = vmatmul.mubr.msk.f32.gmra.mxu0 %vm135_vm0, %v80_v35  ;;  %882 = vmatmul.mubr.msk.f32.gmra.mxu1 %vm135_vm0, %v80_v35 }
 0x108   :  { %v211_v47 = vpop.f32.mrf.mxu0  ;;  %v294_v48 = vpop.f32.mrf.mxu1 }
 0x109   :  { %v212_v49 = vadd.f32 %v211_v47, %v118_v43  ;;  %v295_v50 = vadd.f32 %v294_v48, %v126_v44 }
 0x10a   :  { %v213_v51 = vpop.f32.mrf.mxu0  ;;  %v296_v52 = vpop.f32.mrf.mxu1 }
 0x10b   :  { %311 = vst [vmem:[#allocation2] sm:$0xff] %v212_v49  ;;  %313 = vst [vmem:[#allocation2 + $0x10] sm:$0xff] %v295_v50  ;;  %v214_v53 = vadd.f32 %v213_v51, %v122_v45  ;;  %v297_v54 = vadd.f32 %v296_v52, %v130_v46 }
 0x10c   :  { %v217_v55 = vpop.f32.mrf.mxu0  ;;  %v300_v56 = vpop.f32.mrf.mxu1 }
 0x10d   :  { %312 = vst [vmem:[#allocation2 + $0x8] sm:$0xff] %v214_v53  ;;  %314 = vst [vmem:[#allocation2 + $0x18] sm:$0xff] %v297_v54  ;;  %v218_v57 = vadd.f32 %v217_v55, %v118_v43  ;;  %v301_v58 = vadd.f32 %v300_v56, %v126_v44 }
 0x10e   :  { %v219_v59 = vpop.f32.mrf.mxu0  ;;  %v302_v60 = vpop.f32.mrf.mxu1 }
 0x10f   :  { %315 = vst [vmem:[#allocation2 + $0x20] sm:$0xff] %v218_v57  ;;  %317 = vst [vmem:[#allocation2 + $0x30] sm:$0xff] %v301_v58  ;;  %v220_v61 = vadd.f32 %v219_v59, %v122_v45  ;;  %v303_v62 = vadd.f32 %v302_v60, %v130_v46 }
 0x110   :  { %v223_v63 = vpop.f32.mrf.mxu0  ;;  %v306_v0 = vpop.f32.mrf.mxu1 }
 0x111   :  { %316 = vst [vmem:[#allocation2 + $0x28] sm:$0xff] %v220_v61  ;;  %318 = vst [vmem:[#allocation2 + $0x38] sm:$0xff] %v303_v62  ;;  %v224_v1 = vadd.f32 %v223_v63, %v118_v43  ;;  %v307_v2 = vadd.f32 %v306_v0, %v126_v44 }
 0x112   :  { %v225_v3 = vpop.f32.mrf.mxu0  ;;  %v308_v4 = vpop.f32.mrf.mxu1 }
 0x113   :  { %319 = vst [vmem:[#allocation2 + $0x40] sm:$0xff] %v224_v1  ;;  %321 = vst [vmem:[#allocation2 + $0x50] sm:$0xff] %v307_v2  ;;  %v226_v5 = vadd.f32 %v225_v3, %v122_v45  ;;  %v309_v6 = vadd.f32 %v308_v4, %v130_v46 }
 0x115   :  { %320 = vst [vmem:[#allocation2 + $0x48] sm:$0xff] %v226_v5  ;;  %322 = vst [vmem:[#allocation2 + $0x58] sm:$0xff] %v309_v6 }
 0x116 LB: > { %v525_v7 = vld [vmem:[#allocation10 + $0x170] sm:$0xff]  ;;  %v524_v8 = vld [vmem:[#allocation10 + $0x168] sm:$0xff]  ;;  %v522_v9 = vld [vmem:[#allocation10 + $0x158] sm:$0xff]  ;;  %v1205_v11 = vmov 0.0   ;;  %s1397_s16 = sshll.u32 %s1194_s1, 4  ;;  %vm1206_vm1 = vmmov 0   ;;  %s1194_s1 = sphi %s1389_s1, %s328_s1  }
 0x117   : > { %527 = vmatprep.subr.mxu0 %v525_v7  ;;  %v521_v10 = vld [vmem:[#allocation10 + $0x150] sm:$0xff]  ;;  %955 = vmatprep.subr.mxu1 %v1205_v11  ;;  %v519_v12 = vld [vmem:[#allocation10 + $0x140] sm:$0xff]  ;;  %v518_v13 = vld [vmem:[#allocation10 + $0x138] sm:$0xff]  ;;  %s1400_s17 = sld [smem:[#allocation6 + %s1397_s16]]  ;;  %s338_s18 = sadd.s32 1, %s1397_s16 }
 0x118   : > { %528 = vmatpush1.msra.mxu0 %v524_v8  ;;  %591 = vmatprep.mubr.f32.mxu0 %v1205_v11  ;;  %v516_v14 = vld [vmem:[#allocation10 + $0x128] sm:$0xff]  ;;  %s1404_s19 = sld [smem:[#allocation6 + %s338_s18]]  ;;  %s899_s21 = sadd.s32 2, %s1397_s16  ;;  %v515_v15 = vld [vmem:[#allocation10 + $0x120] sm:$0xff]  ;;  %v513_v16 = vld [vmem:[#allocation10 + $0x110] sm:$0xff] }
 0x119   : > { %529 = vmatprep.subr.mxu0 %v522_v9  ;;  %987 = vmatprep.mubr.msk.f32.mxu1 %vm1206_vm1, %v1205_v11  ;;  %s1407_s22 = sld [smem:[#allocation6 + %s899_s21]]  ;;  %s355_s3 = sadd.s32 1, %s899_s21  ;;  %v512_v17 = vld [vmem:[#allocation10 + $0x108] sm:$0xff]  ;;  %v526_v18 = vld [vmem:[#allocation10 + $0x178] sm:$0xff]  ;;  %v523_v20 = vld [vmem:[#allocation10 + $0x160] sm:$0xff] }
 0x11a   : > { %530 = vmatpush1.msra.mxu0 %v521_v10  ;;  %s1409_s5 = sld [smem:[#allocation6 + %s355_s3]]  ;;  %s901_s23 = sadd.s32 4, %s1397_s16  ;;  %v510_v19 = vld [vmem:[#allocation10 + $0xf8] sm:$0xff]  ;;  %956 = vmatpush3.msra.mxu1 %v526_v18  ;;  %v509_v21 = vld [vmem:[#allocation10 + $0xf0] sm:$0xff]  ;;  %v520_v22 = vld [vmem:[#allocation10 + $0x148] sm:$0xff] }
 0x11b   : > { %531 = vmatprep.subr.mxu0 %v519_v12  ;;  %s1412_s24 = sld [smem:[#allocation6 + %s901_s23]]  ;;  %s372_s25 = sadd.s32 1, %s901_s23  ;;  %957 = vmatprep.subr.mxu1 %v1205_v11  ;;  %v507_v23 = vld [vmem:[#allocation10 + $0xe0] sm:$0xff]  ;;  %v506_v24 = vld [vmem:[#allocation10 + $0xd8] sm:$0xff]  ;;  %v504_v25 = vld [vmem:[#allocation10 + $0xc8] sm:$0xff] }
 0x11c   : > { %532 = vmatpush1.msra.mxu0 %v518_v13  ;;  %s1414_s26 = sld [smem:[#allocation6 + %s372_s25]]  ;;  %s903_s27 = sadd.s32 6, %s1397_s16  ;;  %958 = vmatpush3.msra.mxu1 %v523_v20  ;;  %v503_v26 = vld [vmem:[#allocation10 + $0xc0] sm:$0xff]  ;;  %v517_v27 = vld [vmem:[#allocation10 + $0x130] sm:$0xff]  ;;  %v514_v29 = vld [vmem:[#allocation10 + $0x118] sm:$0xff] }
 0x11d   : > { %533 = vmatprep.subr.mxu0 %v516_v14  ;;  %959 = vmatprep.subr.mxu1 %v1205_v11  ;;  %v501_v28 = vld [vmem:[#allocation10 + $0xb0] sm:$0xff]  ;;  %s332_s28 = scalar_lea.vmem [#allocation14], %s1400_s17  ;;  %v500_v31 = vld [vmem:[#allocation10 + $0xa8] sm:$0xff]  ;;  %s335_s29 = scalar_lea.vmem [#allocation13], %s1400_s17  ;;  %v498_v35 = vld [vmem:[#allocation10 + $0x98] sm:$0xff] }
 0x11e   : > { %534 = vmatpush1.msra.mxu0 %v515_v15  ;;  %960 = vmatpush3.msra.mxu1 %v520_v22  ;;  %v333_v30 = vld [vmem:[%s332_s28] sm:$0x1]  ;;  %s340_s30 = scalar_lea.vmem [#allocation14], %s1404_s19  ;;  %s343_s0 = scalar_lea.vmem [#allocation13], %s1404_s19  ;;  %v497_v39 = vld [vmem:[#allocation10 + $0x90] sm:$0xff]  ;;  %v511_v40 = vld [vmem:[#allocation10 + $0x100] sm:$0xff] }
 0x11f   : > { %535 = vmatprep.subr.mxu0 %v513_v16  ;;  %961 = vmatprep.subr.mxu1 %v1205_v11  ;;  %334 = vst [vmem:[#allocation3] sm:$0x1] %v333_v30  ;;  %v336_v32 = vld [vmem:[%s335_s29] sm:$0x1]  ;;  %s349_s8 = scalar_lea.vmem [#allocation14], %s1407_s22  ;;  %s352_s9 = scalar_lea.vmem [#allocation13], %s1407_s22 }
 0x120   : > { %536 = vmatpush1.msra.mxu0 %v512_v17  ;;  %v341_v33 = vld [vmem:[%s340_s30] sm:$0x1]  ;;  %962 = vmatpush3.msra.mxu1 %v517_v27  ;;  %337 = vst [vmem:[#allocation4] sm:$0x1] %v336_v32  ;;  %s357_s10 = scalar_lea.vmem [#allocation14], %s1409_s5  ;;  %s360_s11 = scalar_lea.vmem [#allocation13], %s1409_s5 }
 0x121   : > { %537 = vmatprep.subr.mxu0 %v510_v19  ;;  %v344_v34 = vld [vmem:[%s343_s0] sm:$0x1]  ;;  %342 = vst [vmem:[#allocation3 + $0x8] sm:$0x1] %v341_v33  ;;  %963 = vmatprep.subr.mxu1 %v1205_v11  ;;  %v508_v42 = vld [vmem:[#allocation10 + $0xe8] sm:$0xff]  ;;  %s366_s12 = scalar_lea.vmem [#allocation14], %s1412_s24 }
 0x122   : > { %538 = vmatpush1.msra.mxu0 %v509_v21  ;;  %345 = vst [vmem:[#allocation4 + $0x8] sm:$0x1] %v344_v34  ;;  %v350_v36 = vld [vmem:[%s349_s8] sm:$0x1]  ;;  %964 = vmatpush3.msra.mxu1 %v514_v29  ;;  %s369_s2 = scalar_lea.vmem [#allocation13], %s1412_s24  ;;  %s374_s13 = scalar_lea.vmem [#allocation14], %s1414_s26 }
 0x123   : > { %539 = vmatprep.subr.mxu0 %v507_v23  ;;  %v353_v37 = vld [vmem:[%s352_s9] sm:$0x1]  ;;  %351 = vst [vmem:[#allocation3 + $0x1] sm:$0x1] %v350_v36  ;;  %965 = vmatprep.subr.mxu1 %v1205_v11  ;;  %s377_s14 = scalar_lea.vmem [#allocation13], %s1414_s26  ;;  %s1436_s15 = sld [smem:[#allocation6 + %s903_s27]] }
 0x124   : > { %540 = vmatpush1.msra.mxu0 %v506_v24  ;;  %v358_v38 = vld [vmem:[%s357_s10] sm:$0x1]  ;;  %354 = vst [vmem:[#allocation4 + $0x1] sm:$0x1] %v353_v37  ;;  %s389_s17 = sadd.s32 1, %s903_s27  ;;  %v495_v47 = vld [vmem:[#allocation10 + $0x80] sm:$0xff]  ;;  %966 = vmatpush3.msra.mxu1 %v511_v40 }
 0x125   : > { %541 = vmatprep.subr.mxu0 %v504_v25  ;;  %359 = vst [vmem:[#allocation3 + $0x9] sm:$0x1] %v358_v38  ;;  %v361_v41 = vld [vmem:[%s360_s11] sm:$0x1]  ;;  %s1440_s18 = sld [smem:[#allocation6 + %s389_s17]]  ;;  %s905_s19 = sadd.s32 8, %s1397_s16  ;;  %967 = vmatprep.subr.mxu1 %v1205_v11 }
 0x126   : > { %542 = vmatpush1.msra.mxu0 %v503_v26  ;;  %362 = vst [vmem:[#allocation4 + $0x9] sm:$0x1] %v361_v41  ;;  %v367_v43 = vld [vmem:[%s366_s12] sm:$0x1]  ;;  %s1444_s21 = sld [smem:[#allocation6 + %s905_s19]]  ;;  %s406_s22 = sadd.s32 1, %s905_s19  ;;  %968 = vmatpush3.msra.mxu1 %v508_v42 }
 0x127   : > { %v370_v44 = vld [vmem:[%s369_s2] sm:$0x1]  ;;  %543 = vmatprep.subr.mxu0 %v501_v28  ;;  %368 = vst [vmem:[#allocation3 + $0x2] sm:$0x1] %v367_v43  ;;  %v505_v49 = vld [vmem:[#allocation10 + $0xd0] sm:$0xff]  ;;  %v492_v50 = vld [vmem:[#allocation10 + $0x68] sm:$0xff]  ;;  %969 = vmatprep.subr.mxu1 %v1205_v11 }
 0x128   : > { %371 = vst [vmem:[#allocation4 + $0x2] sm:$0x1] %v370_v44  ;;  %v375_v45 = vld [vmem:[%s374_s13] sm:$0x1]  ;;  %544 = vmatpush1.msra.mxu0 %v500_v31  ;;  %s1446_s3 = sld [smem:[#allocation6 + %s406_s22]]  ;;  %s907_s5 = sadd.s32 10, %s1397_s16  ;;  %970 = vmatpush3.msra.mxu1 %v505_v49 }
 0x129   : > { %v378_v46 = vld [vmem:[%s377_s14] sm:$0x1]  ;;  %376 = vst [vmem:[#allocation3 + $0xa] sm:$0x1] %v375_v45  ;;  %545 = vmatprep.subr.mxu0 %v498_v35  ;;  %v491_v51 = vld [vmem:[#allocation10 + $0x60] sm:$0xff]  ;;  %s1449_s23 = sld [smem:[#allocation6 + %s907_s5]]  ;;  %971 = vmatprep.subr.mxu1 %v1205_v11 }
 0x12a   : > { %379 = vst [vmem:[#allocation4 + $0xa] sm:$0x1] %v378_v46  ;;  %v494_v48 = vld [vmem:[#allocation10 + $0x78] sm:$0xff]  ;;  %546 = vmatpush1.msra.mxu0 %v497_v39  ;;  %s423_s24 = sadd.s32 1, %s907_s5  ;;  %v489_v53 = vld [vmem:[#allocation10 + $0x50] sm:$0xff]  ;;  %v488_v54 = vld [vmem:[#allocation10 + $0x48] sm:$0xff] }
 0x12b   : > { %547 = vmatprep.subr.mxu0 %v495_v47  ;;  %v502_v52 = vld [vmem:[#allocation10 + $0xb8] sm:$0xff]  ;;  %s1452_s25 = sld [smem:[#allocation6 + %s423_s24]]  ;;  %s909_s26 = sadd.s32 12, %s1397_s16  ;;  %v485_v56 = vld [vmem:[#allocation10 + $0x30] sm:$0xff]  ;;  %v499_v57 = vld [vmem:[#allocation10 + $0xa0] sm:$0xff] }
 0x12c   : > { %548 = vmatpush1.msra.mxu0 %v494_v48  ;;  %v486_v55 = vld [vmem:[#allocation10 + $0x38] sm:$0xff]  ;;  %v496_v58 = vld [vmem:[#allocation10 + $0x88] sm:$0xff]  ;;  %v483_v59 = vld [vmem:[#allocation10 + $0x20] sm:$0xff]  ;;  %s383_s27 = scalar_lea.vmem [#allocation14], %s1436_s15  ;;  %s386_s28 = scalar_lea.vmem [#allocation13], %s1436_s15  ;;  %972 = vmatpush3.msra.mxu1 %v502_v52 }
 0x12d   : > { %549 = vmatprep.subr.mxu0 %v492_v50  ;;  %v384_v60 = vld [vmem:[%s383_s27] sm:$0x1]  ;;  %s391_s29 = scalar_lea.vmem [#allocation14], %s1440_s18  ;;  %s394_s30 = scalar_lea.vmem [#allocation13], %s1440_s18  ;;  %973 = vmatprep.subr.mxu1 %v1205_v11  ;;  %v493_v1 = vld [vmem:[#allocation10 + $0x70] sm:$0xff]  ;;  %v480_v2 = vld [vmem:[#allocation10 + $0x8] sm:$0xff] }
 0x12e   : > { %550 = vmatpush1.msra.mxu0 %v491_v51  ;;  %v387_v61 = vld [vmem:[%s386_s28] sm:$0x1]  ;;  %385 = vst [vmem:[#allocation3 + $0x3] sm:$0x1] %v384_v60  ;;  %s400_s0 = scalar_lea.vmem [#allocation14], %s1444_s21  ;;  %s403_s8 = scalar_lea.vmem [#allocation13], %s1444_s21  ;;  %974 = vmatpush3.msra.mxu1 %v499_v57 }
 0x12f   : > { %551 = vmatprep.subr.mxu0 %v489_v53  ;;  %v482_v62 = vld [vmem:[#allocation10 + $0x18] sm:$0xff]  ;;  %388 = vst [vmem:[#allocation4 + $0x3] sm:$0x1] %v387_v61  ;;  %v479_v5 = vld [vmem:[#allocation10] sm:$0xff]  ;;  %s408_s9 = scalar_lea.vmem [#allocation14], %s1446_s3  ;;  %s411_s10 = scalar_lea.vmem [#allocation13], %s1446_s3  ;;  %975 = vmatprep.subr.mxu1 %v1205_v11 }
 0x130   : > { %v392_v63 = vld [vmem:[%s391_s29] sm:$0x1]  ;;  %552 = vmatpush1.msra.mxu0 %v488_v54  ;;  %s417_s11 = scalar_lea.vmem [#allocation14], %s1449_s23  ;;  %s420_s12 = scalar_lea.vmem [#allocation13], %s1449_s23  ;;  %976 = vmatpush3.msra.mxu1 %v496_v58  ;;  %v487_v15 = vld [vmem:[#allocation10 + $0x40] sm:$0xff]  ;;  %v484_v16 = vld [vmem:[#allocation10 + $0x28] sm:$0xff] }
 0x131   : > { %v395_v0 = vld [vmem:[%s394_s30] sm:$0x1]  ;;  %393 = vst [vmem:[#allocation3 + $0xb] sm:$0x1] %v392_v63  ;;  %553 = vmatprep.subr.mxu0 %v486_v55  ;;  %s425_s2 = scalar_lea.vmem [#allocation14], %s1452_s25  ;;  %s428_s13 = scalar_lea.vmem [#allocation13], %s1452_s25  ;;  %977 = vmatprep.subr.mxu1 %v1205_v11 }
 0x132   : > { %396 = vst [vmem:[#allocation4 + $0xb] sm:$0x1] %v395_v0  ;;  %v401_v3 = vld [vmem:[%s400_s0] sm:$0x1]  ;;  %554 = vmatpush1.msra.mxu0 %v485_v56  ;;  %s433_s14 = sld [smem:[#allocation6 + %s909_s26]]  ;;  %s440_s15 = sadd.s32 1, %s909_s26  ;;  %978 = vmatpush3.msra.mxu1 %v493_v1 }
 0x133   : > { %v404_v4 = vld [vmem:[%s403_s8] sm:$0x1]  ;;  %402 = vst [vmem:[#allocation3 + $0x4] sm:$0x1] %v401_v3  ;;  %555 = vmatprep.subr.mxu0 %v483_v59  ;;  %s441_s17 = sld [smem:[#allocation6 + %s440_s15]]  ;;  %s911_s18 = sadd.s32 14, %s1397_s16  ;;  %979 = vmatprep.subr.mxu1 %v1205_v11 }
 0x134   : > { %405 = vst [vmem:[#allocation4 + $0x4] sm:$0x1] %v404_v4  ;;  %v409_v6 = vld [vmem:[%s408_s9] sm:$0x1]  ;;  %556 = vmatpush1.msra.mxu0 %v482_v62  ;;  %s1476_s19 = sld [smem:[#allocation6 + %s911_s18]]  ;;  %s457_s21 = sadd.s32 1, %s911_s18 }
 0x135   : > { %v412_v7 = vld [vmem:[%s411_s10] sm:$0x1]  ;;  %410 = vst [vmem:[#allocation3 + $0xc] sm:$0x1] %v409_v6  ;;  %557 = vmatprep.subr.mxu0 %v480_v2  ;;  %s1479_s22 = sld [smem:[#allocation6 + %s457_s21]]  ;;  %v481_v17 = vld [vmem:[#allocation10 + $0x10] sm:$0xff] }
 0x136   : > { %v490_v8 = vld [vmem:[#allocation10 + $0x58] sm:$0xff]  ;;  %413 = vst [vmem:[#allocation4 + $0xc] sm:$0x1] %v412_v7  ;;  %558 = vmatpush1.msra.mxu0 %v479_v5  ;;  %v698_v29 = vld [vmem:[#allocation12 + $0x70] sm:$0xff]  ;;  %v696_v30 = vld [vmem:[#allocation12 + $0x60] sm:$0xff]  ;;  %s1489_s28 = sshll.u32 %s1194_s1, 3 }
 0x137   : > { %v418_v9 = vld [vmem:[%s417_s11] sm:$0x1]  ;;  %980 = vmatpush3.msra.mxu1 %v490_v8  ;;  %v694_v32 = vld [vmem:[#allocation12 + $0x50] sm:$0xff]  ;;  %v693_v33 = vld [vmem:[#allocation12 + $0x48] sm:$0xff]  ;;  %s470_s29 = sshra.s32 %s1489_s28, 3  ;;  %s796_s8 = scalar_lea.vmem [#allocation13], %s1489_s28 }
 0x138   : > { %v421_v10 = vld [vmem:[%s420_s12] sm:$0x1]  ;;  %419 = vst [vmem:[#allocation3 + $0x5] sm:$0x1] %v418_v9  ;;  %981 = vmatprep.subr.mxu1 %v1205_v11  ;;  %s434_s16 = scalar_lea.vmem [#allocation14], %s433_s14  ;;  %s437_s3 = scalar_lea.vmem [#allocation13], %s433_s14 }
 0x139   : > { %422 = vst [vmem:[#allocation4 + $0x5] sm:$0x1] %v421_v10  ;;  %v426_v12 = vld [vmem:[%s425_s2] sm:$0x1]  ;;  %982 = vmatpush3.msra.mxu1 %v487_v15  ;;  %s442_s5 = scalar_lea.vmem [#allocation14], %s441_s17  ;;  %s445_s23 = scalar_lea.vmem [#allocation13], %s441_s17 }
 0x13a   : > { %v429_v13 = vld [vmem:[%s428_s13] sm:$0x1]  ;;  %427 = vst [vmem:[#allocation3 + $0xd] sm:$0x1] %v426_v12  ;;  %983 = vmatprep.subr.mxu1 %v1205_v11  ;;  %s451_s24 = scalar_lea.vmem [#allocation14], %s1476_s19  ;;  %s454_s25 = scalar_lea.vmem [#allocation13], %s1476_s19 }
 0x13b   : > { %430 = vst [vmem:[#allocation4 + $0xd] sm:$0x1] %v429_v13  ;;  %v699_v14 = vld [vmem:[#allocation12 + $0x78] sm:$0xff]  ;;  %984 = vmatpush3.msra.mxu1 %v484_v16  ;;  %s459_s26 = scalar_lea.vmem [#allocation14], %s1479_s22  ;;  %s462_s27 = scalar_lea.vmem [#allocation13], %s1479_s22  ;;  %v692_v34 = vld [vmem:[#allocation12 + $0x40] sm:$0xff] }
 0x13c   : > { %990 = vmatprep.subr.mxu0 %v699_v14  ;;  %v435_v18 = vld [vmem:[%s434_s16] sm:$0x1]  ;;  %985 = vmatprep.subr.mxu1 %v1205_v11  ;;  %v697_v11 = vld [vmem:[#allocation12 + $0x68] sm:$0xff]  ;;  %v690_v36 = vld [vmem:[#allocation12 + $0x30] sm:$0xff]  ;;  %s912_s30 = sshll.u32 %s470_s29, 5  ;;  %s798_s9 = scalar_lea.vmem [#allocation14], %s1489_s28 }
 0x13d   : > { %v438_v19 = vld [vmem:[%s437_s3] sm:$0x1]  ;;  %436 = vst [vmem:[#allocation3 + $0x6] sm:$0x1] %v435_v18  ;;  %986 = vmatpush3.msra.mxu1 %v481_v17  ;;  %v689_v37 = vld [vmem:[#allocation12 + $0x28] sm:$0xff]  ;;  %v688_v38 = vld [vmem:[#allocation12 + $0x20] sm:$0xff] }
 0x13e   : > { %439 = vst [vmem:[#allocation4 + $0x6] sm:$0x1] %v438_v19  ;;  %v443_v20 = vld [vmem:[%s442_s5] sm:$0x1]  ;;  %v686_v40 = vld [vmem:[#allocation12 + $0x10] sm:$0xff]  ;;  %v685_v41 = vld [vmem:[#allocation12 + $0x8] sm:$0xff] }
 0x13f   : > { %v446_v21 = vld [vmem:[%s445_s23] sm:$0x1]  ;;  %444 = vst [vmem:[#allocation3 + $0xe] sm:$0x1] %v443_v20  ;;  %v684_v42 = vld [vmem:[#allocation12] sm:$0xff]  ;;  %s474_s0 = scalar_lea.vmem [#allocation2], %s912_s30 }
 0x140   : > { %447 = vst [vmem:[#allocation4 + $0xe] sm:$0x1] %v446_v21  ;;  %v452_v22 = vld [vmem:[%s451_s24] sm:$0x1]  ;;  %v478_v50 = vld [vmem:[%s474_s0 + $0x18] sm:$0xff]  ;;  %v476_v57 = vld [vmem:[%s474_s0 + $0x8] sm:$0xff] }
 0x141   : > { %v455_v23 = vld [vmem:[%s454_s25] sm:$0x1]  ;;  %453 = vst [vmem:[#allocation3 + $0x7] sm:$0x1] %v452_v22  ;;  %v477_v59 = vld [vmem:[%s474_s0 + $0x10] sm:$0xff]  ;;  %s328_s1 = sadd.s32 1, %s1194_s1  }
 0x142   : > { %456 = vst [vmem:[#allocation4 + $0x7] sm:$0x1] %v455_v23  ;;  %v460_v24 = vld [vmem:[%s459_s26] sm:$0x1]  ;;  %p325_p6 = scmp.ge.s32.totalorder %s328_s1, 3  }
 0x143   : > { %v463_v25 = vld [vmem:[%s462_s27] sm:$0x1]  ;;  %461 = vst [vmem:[#allocation3 + $0xf] sm:$0x1] %v460_v24  ;;  %s1207_s10 = smov (%p325_p6), [#allocation13]   ;;  %s1208_s12 = smov (%p325_p6), [#allocation14]  }
 0x144   : > { %464 = vst [vmem:[#allocation4 + $0xf] sm:$0x1] %v463_v25  ;;  %v695_v31 = vld [vmem:[#allocation12 + $0x58] sm:$0xff]  ;;  %s805_s11 = sshll.u32 (%p325_p6), %s1207_s10, 4  ;;  %s817_s2 = sshll.u32 (%p325_p6), %s1208_s12, 4  ;;  %s806_s11 = int_to_ptr.vmem [resolvable:$true] %s805_s11  ;;  %s818_s2 = int_to_ptr.vmem [resolvable:$true] %s817_s2 }
 0x145   : > { %v691_v35 = vld [vmem:[#allocation12 + $0x38] sm:$0xff]  ;;  %s1138_s13 = scalar_lea.vmem (%p325_p6), %s806_s11, 512  ;;  %p1143_p8 = scmp.lt.s32.totalorder (%p325_p6), %s806_s11, %s806_s11 }
 0x146   : > { %v687_v39 = vld [vmem:[#allocation12 + $0x18] sm:$0xff]  ;;  %p1139_p7 = scmp.ne.s32.totalorder (%p325_p6), %s806_s11, %s1138_s13  ;;  %p1144_p9 = scmp.lt.s32.totalorder (%p325_p6), %s1138_s13, %s1138_s13 }
 0x147   : > { %v475_v45 = vld [vmem:[%s474_s0] sm:$0xff] }
 0x148   : > { %v465_v26 = vld [vmem:[#allocation3] sm:$0xff]  ;;  %p1145_p10 = por (%p325_p6), %p1144_p9, %p1143_p8 }
 0x149   : > { %v467_v8 = vld [vmem:[#allocation4] sm:$0xff] }
 0x14a   : > { %v466_v27 = vld [vmem:[#allocation3 + $0x8] sm:$0xff]  ;;  %p1146_p11 = pnand (%p325_p6), %p1145_p10, %p1139_p7 }
 0x14b   : > { %v469_v28 = vadd.f32 %v466_v27, %v465_v26  ;;  %v468_v7 = vld [vmem:[#allocation4 + $0x8] sm:$0xff] }
 0x14d   : > { %592 = vmatmul.mubr.f32.vlgmr.msra.gmra.mxu0 %v469_v28  ;;  %988 = vmatmul.mubr.f32.vlgmr.msra.gmra.mxu1 %v469_v28 }
 0x14e   : > { %991 = vmatpush3.msra.mxu0 %v699_v14  ;;  %1022 = vmatprep.mubr.f32.mxu0 %v465_v26 }
 0x14f   : > { %992 = vmatprep.subr.mxu0 %v698_v29 }
 0x150   : > { %993 = vmatpush3.msra.mxu0 %v698_v29 }
 0x151   : > { %994 = vmatprep.subr.mxu0 %v697_v11 }
 0x152   : > { %995 = vmatpush3.msra.mxu0 %v697_v11 }
 0x153   : > { %996 = vmatprep.subr.mxu0 %v696_v30 }
 0x154   : > { %997 = vmatpush3.msra.mxu0 %v696_v30 }
 0x155   : > { %998 = vmatprep.subr.mxu0 %v695_v31 }
 0x156   : > { %999 = vmatpush3.msra.mxu0 %v695_v31 }
 0x157   : > { %1000 = vmatprep.subr.mxu0 %v694_v32 }
 0x158   : > { %1001 = vmatpush3.msra.mxu0 %v694_v32 }
 0x159   : > { %1002 = vmatprep.subr.mxu0 %v693_v33 }
 0x15a   : > { %1003 = vmatpush3.msra.mxu0 %v693_v33 }
 0x15b   : > { %1004 = vmatprep.subr.mxu0 %v692_v34 }
 0x15c   : > { %1005 = vmatpush3.msra.mxu0 %v692_v34 }
 0x15d   : > { %1006 = vmatprep.subr.mxu0 %v691_v35 }
 0x15e   : > { %1007 = vmatpush3.msra.mxu0 %v691_v35 }
 0x15f   : > { %1008 = vmatprep.subr.mxu0 %v690_v36 }
 0x160   : > { %1009 = vmatpush3.msra.mxu0 %v690_v36 }
 0x161   : > { %1010 = vmatprep.subr.mxu0 %v689_v37 }
 0x162   : > { %1011 = vmatpush3.msra.mxu0 %v689_v37 }
 0x163   : > { %1012 = vmatprep.subr.mxu0 %v688_v38 }
 0x164   : > { %1013 = vmatpush3.msra.mxu0 %v688_v38 }
 0x165   : > { %1014 = vmatprep.subr.mxu0 %v687_v39 }
 0x166   : > { %1015 = vmatpush3.msra.mxu0 %v687_v39 }
 0x167   : > { %1016 = vmatprep.subr.mxu0 %v686_v40 }
 0x168   : > { %1017 = vmatpush3.msra.mxu0 %v686_v40 }
 0x169   : > { %1018 = vmatprep.subr.mxu0 %v685_v41 }
 0x16a   : > { %1019 = vmatpush3.msra.mxu0 %v685_v41 }
 0x16b   : > { %1020 = vmatprep.subr.mxu0 %v684_v42 }
 0x16c   : > { %1021 = vmatpush3.msra.mxu0 %v684_v42 }
 0x16d   : > { %1023 = vmatmul.mubr.f32.vlgmr.msra.gmra.mxu0 %v466_v27 }
 0x20d   : > { %v664_v43 = vpop.f32.mrf.mxu1  ;;  %v593_v46 = vpop.f32.mrf.mxu0 }
 0x20e   : > { %v668_v47 = vadd.f32 %v593_v46, %v475_v45  ;;  %v670_v61 = vadd.f32 %v664_v43, %v477_v59 }
 0x20f   : > { %v989_v44 = vpop.f32.mrf.mxu1  ;;  %v595_v49 = vpop.f32.mrf.mxu0 }
 0x210   : > { %v894_v48 = vmul.f32 -1.442695, %v668_v47  ;;  %v669_v58 = vadd.f32 %v595_v49, %v476_v57 }
 0x212   : > { %1046 = vpow2.f32 %v894_v48  ;;  %v895_v62 = vmul.f32 -1.442695, %v669_v58 }
 0x21f   : > { %v1047_v60 = vpop.eup %1046 }
 0x220   : > { %v674_v0 = vadd.f32 1.0, %v1047_v60 }
 0x22d   : > { %v1024_v51 = vpop.f32.mrf.mxu0 }
 0x22e   : > { %v783_v52 = vadd.f32 %v1024_v51, %v478_v50 }
 0x22f   : > { %v766_v53 = vpop.f32.mrf.mxu0 }
 0x230   : > { %v897_v54 = vmul.f32 -1.442695, %v783_v52  ;;  %v775_v55 = vadd.f32 %v766_v53, %v478_v50 }
 0x232   : > { %1048 = vpow2.f32 %v897_v54  ;;  %v896_v56 = vmul.f32 -1.442695, %v775_v55 }
 0x234   : > { %1050 = vpow2.f32 %v896_v56 }
 0x235   : > { %1052 = vtanh.f32 %v670_v61 }
 0x236   : > { %1054 = vpow2.f32 %v895_v62 }
 0x23f   : > { %v1049_v63 = vpop.eup %1048 }
 0x240   : > { %v787_v1 = vadd.f32 1.0, %v1049_v63 }
 0x241   : > { %v1051_v2 = vpop.eup %1050 }
 0x242   : > { %1056 = vrcp.f32 %v787_v1  ;;  %v779_v3 = vadd.f32 1.0, %v1051_v2  ;;  %v1053_v4 = vpop.eup %1052 }
 0x243   : > { %1058 = vrcp.f32 %v674_v0  ;;  %v1055_v5 = vpop.eup %1054 }
 0x244   : > { %1060 = vrcp.f32 %v779_v3  ;;  %v680_v14 = vadd.f32 1.0, %v1055_v5 }
 0x246   : > { %1062 = vrcp.f32 %v680_v14 }
 0x24f   : > { %v1057_v6 = vpop.eup %1056 }
 0x250   : > { %v1059_v9 = vpop.eup %1058  ;;  %v790_v12 = vmul.f32 %v1057_v6, %v468_v7 }
 0x251   : > { %v1061_v10 = vpop.eup %1060  ;;  %v792_v15 = vmul.f32 %v1059_v9, %v1053_v4 }
 0x252   : > { %v782_v13 = vmul.f32 %v1061_v10, %v467_v8 }
 0x253   : > { %v1063_v18 = vpop.eup %1062 }
 0x254   : > { %v791_v16 = vadd.f32 %v790_v12, %v782_v13 }
 0x256   : > { %v793_v17 = vadd.f32 %v792_v15, %v791_v16 }
 0x258   : > { %1064 = vtanh.f32 %v793_v17  ;;  %797 = vst [vmem:[%s796_s8] sm:$0xff] %v793_v17 }
 0x264   :  { %327 = sbr.rel (!%p325_p6) target bundleno = 278 (0x116), region = 102 }
 0x265   : > { %v1065_v19 = vpop.eup %1064 }
 0x266   : > { %v795_v20 = vmul.f32 %v1065_v19, %v1063_v18 }
 0x268   : > { %799 = vst [vmem:[%s798_s9] sm:$0xff] %v795_v20 }
 0x269   :  { %1149 = shalt.err (!%p1146_p11)
}
 0x26a   :  { %811 = dma.vmem_to_hbm [thread:$0]  %s806_s11, 512, %s1515_s6, [#allocation9], %s1202_s4, %s1202_s4, %s1203_s20  }
 0x26b   :  { %s1158_s1 = scalar_lea.vmem %s818_s2, 512  ;;  %p1163_p13 = scmp.lt.s32.totalorder %s818_s2, %s818_s2 }
 0x26c   :  { %p1159_p12 = scmp.ne.s32.totalorder %s818_s2, %s1158_s1  ;;  %p1164_p0 = scmp.lt.s32.totalorder %s1158_s1, %s1158_s1 }
 0x26e   :  { %p1165_p1 = por %p1164_p0, %p1163_p13 }
 0x270   :  { %p1166_p2 = pnand %p1165_p1, %p1159_p12 }
 0x272   :  { %1169 = shalt.err (!%p1166_p2)
}
 0x273   :  { %823 = dma.vmem_to_hbm [thread:$0]  %s818_s2, 512, %s1516_s7, [#allocation15], %s1202_s4, %s1202_s4, %s1203_s20  }
 0x274   :  { %1188 = dma.done.wait [#allocation9], 512  }
 0x275   :  { %1189 = vsyncadd [#allocation9], 4294966784 }
 0x276   :  { %1190 = dma.done.wait [#allocation15], 512  }
 0x277   :  { %1191 = vsyncadd [#allocation15], 4294966784 }
 0x278   :  { %830 = vsyncpa [#allocation8], 1 }
 0x279   :  { %831 = vsyncpa [#allocation11], 1 }
 0x27a   :  { %832 = vsyncpa [#allocation9], 1 }
 0x27b   :  { %833 = vsyncpa [#allocation15], 1 }

</bundles_post_ra>
